<compile_context>
chip_gen: v7x
topology: tpu7x:2x2x1
jax: 0.10.0
libtpu: 0.0.40
codegen_flags: <defaults>
</compile_context>

<pallas_src>
import math

import jax
import jax.numpy as jnp
from jax.experimental import pallas as pl
from jax.experimental.pallas import tpu as pltpu

# ---------------- model hyper-parameters (small, deterministic) ----------------
N_LAYERS = 2
VOCAB_SIZE = 50
MAX_LEN = 16
EMBED_SIZE = 32
N_HEADS = 4
HEAD_DIM = EMBED_SIZE // N_HEADS
FF_INNER = 64
BATCH = 2
SEQ = 8
LN_EPS = 1e-5
ROWS = BATCH * SEQ
BIAS_LANES = 3 * EMBED_SIZE          # 96: widest packed bias row (fused QKV bias)
WOUT_ROWS = EMBED_SIZE + FF_INNER    # 96: rows per layer in the packed [Wo; W2] slab


# =====================================================================
# Fused Pallas kernel: full forward pass
# =====================================================================
def fused_encoder_kernel(x_ref,      # (ROWS, E)          f32 activations (embed + PE)
                         wqkv_ref,   # (L, E, 3E)         bf16 fused QKV weights (Q pre-scaled)
                         w1_ref,     # (L, E, FF)         bf16 FFN first linear
                         wout_ref,   # (L+1, E+FF, E)     bf16 per-layer [Wo; W2]; final block = Wf
                         b_ref,      # (L+1, 8, 96)       f32 packed biases + LayerNorm params
                         o_ref):     # (ROWS, E)          f32
    E, F, D, H = EMBED_SIZE, FF_INNER, HEAD_DIM, N_HEADS

    def layer_norm(v, g, b):
        mu = jnp.mean(v, axis=-1, keepdims=True)
        var = jnp.mean(jnp.square(v - mu), axis=-1, keepdims=True)
        return (v - mu) * jax.lax.rsqrt(var + LN_EPS) * g + b

    x = x_ref[...]                                           # (ROWS, E) f32

    for li in range(N_LAYERS):                               # static fused layer loop
        b_blk = b_ref[li]                                    # (8, 96) f32
        bqkv = b_blk[0:1, :]                                 # (1, 3E)  fused QKV bias
        b1   = b_blk[1:2, :F]                                # (1, FF)
        bo   = b_blk[2:3, :E]                                # (1, E)
        b2   = b_blk[3:4, :E]
        ln1g, ln1b = b_blk[4:5, :E], b_blk[5:6, :E]
        ln2g, ln2b = b_blk[6:7, :E], b_blk[7:8, :E]

        wout_blk = wout_ref[li]                              # (E+FF, E) bf16
        wo = wout_blk[:E, :]                                 # (E, E)
        w2 = wout_blk[E:E + F, :]                            # (FF, E)

        # ---- fused QKV projection: one MXU push instead of 12 tiny per-head dots ----
        qkv = jnp.dot(x.astype(jnp.bfloat16), wqkv_ref[li],
                      preferred_element_type=jnp.float32) + bqkv        # (ROWS, 3E) f32
        qkv_bf = qkv.astype(jnp.bfloat16)

        # ---- multi-head self attention (query = key = value = x, no mask) ----
        ctx_heads = []
        for h in range(H):                                   # static head loop
            q3 = qkv_bf[:, h * D:(h + 1) * D].reshape(BATCH, SEQ, D)
            k3 = qkv_bf[:, E + h * D:E + (h + 1) * D].reshape(BATCH, SEQ, D)
            v3 = qkv_bf[:, 2 * E + h * D:2 * E + (h + 1) * D].reshape(BATCH, SEQ, D)
            # batched scores over the batch dim (documented-safe single batch-dim einsum)
            s = jnp.einsum('bqd,bkd->bqk', q3, k3,
                           preferred_element_type=jnp.float32)           # (B, S, S) f32
            s = s - jnp.max(s, axis=-1, keepdims=True)
            p = jnp.exp(s)
            p = p * pl.reciprocal(jnp.sum(p, axis=-1, keepdims=True), approx=True)
            ctx = jnp.einsum('bqk,bkd->bqd', p.astype(jnp.bfloat16), v3,
                             preferred_element_type=jnp.float32)         # (B, S, D) f32
            ctx_heads.append(ctx.reshape(ROWS, D))

        # ---- fused output projection: concat heads on lanes, single (E, E) dot ----
        ctx_slab = jnp.concatenate(ctx_heads, axis=-1).astype(jnp.bfloat16)   # (ROWS, E)
        attn = jnp.dot(ctx_slab, wo, preferred_element_type=jnp.float32) + bo

        # residual + LayerNorm (dropout == identity in eval)
        x1 = layer_norm(x + attn, ln1g, ln1b)

        # ---- feed-forward ----
        hdn = jnp.dot(x1.astype(jnp.bfloat16), w1_ref[li],
                      preferred_element_type=jnp.float32) + b1
        hdn = jnp.maximum(hdn, 0.0)
        ff = jnp.dot(hdn.astype(jnp.bfloat16), w2,
                     preferred_element_type=jnp.float32) + b2

        x = layer_norm(x1 + ff, ln2g, ln2b)

    # ---- final linear (weights live in the last block of the packed slabs) ----
    wf = wout_ref[N_LAYERS][:E, :]                           # (E, E) bf16
    bf_fin = b_ref[N_LAYERS][0:1, :E]                        # (1, E) f32
    o_ref[...] = jnp.dot(x.astype(jnp.bfloat16), wf,
                         preferred_element_type=jnp.float32) + bf_fin


# =====================================================================
# Wrapper
# =====================================================================
def _full_spec(a):
    zeros = (0,) * a.ndim
    return pl.BlockSpec(a.shape, lambda: zeros)


def transformer_encoder(src_tokens, params):
    B, S = src_tokens.shape
    # embedding lookup + positional embedding (plain-JAX glue)
    x = jnp.take(params["embed"], src_tokens, axis=0)         # (B, S, E)
    x = x + params["pe"][None, :S, :]
    x2d = x.reshape(B * S, EMBED_SIZE).astype(jnp.float32)
    # TODO(synk): encoder_padding_mask is None in this synthetic run; masked attention
    #             would add a -inf bias on the scores before softmax.

    args = (x2d, params["wqkv"], params["w1"], params["wout"], params["bias"])

    out2d = pl.pallas_call(
        fused_encoder_kernel,
        out_shape=jax.ShapeDtypeStruct((B * S, EMBED_SIZE), jnp.float32),
        in_specs=[_full_spec(a) for a in args],
        out_specs=pl.BlockSpec((B * S, EMBED_SIZE), lambda: (0, 0)),
        compiler_params=pltpu.CompilerParams(vmem_limit_bytes=32 * 1024 * 1024),
    )(*args)
    return out2d.reshape(B, S, EMBED_SIZE)


transformer_encoder_jit = jax.jit(transformer_encoder)


# =====================================================================
# Parameter construction (deterministic, synthetic)
# =====================================================================
def sinusoidal_pe(max_len, embed):
    pos = jnp.arange(max_len, dtype=jnp.float32)[:, None]
    div = jnp.exp(jnp.arange(0, embed, 2, dtype=jnp.float32)
                  * (-math.log(10000.0) / embed))
    pe = jnp.zeros((max_len, embed), dtype=jnp.float32)
    pe = pe.at[:, 0::2].set(jnp.sin(pos * div))
    pe = pe.at[:, 1::2].set(jnp.cos(pos * div))
    return pe


def init_params(key):
    def dense(k, fan_in, fan_out):
        kw, kb = jax.random.split(k)
        w = jax.random.normal(kw, (fan_in, fan_out), jnp.float32) * 0.05
        b = jax.random.normal(kb, (1, fan_out), jnp.float32) * 0.01
        return w, b

    def row96(v):  # pad a 1-D row out to the packed bias lane width
        return jnp.pad(v, (0, BIAS_LANES - v.shape[0]))

    E, D, H, F, L = EMBED_SIZE, HEAD_DIM, N_HEADS, FF_INNER, N_LAYERS
    keys = jax.random.split(key, 2 + L)
    params = {}
    params["embed"] = jax.random.normal(keys[0], (VOCAB_SIZE, E), jnp.float32) * 0.05
    params["pe"] = sinusoidal_pe(MAX_LEN, E)

    scale = 1.0 / math.sqrt(D)
    wqkv_all, w1_all, wout_all, bias_all = [], [], [], []
    for li in range(L):
        lk = jax.random.split(keys[1 + li], 6)
        wq, bq = dense(lk[0], E, E)
        wk, bk = dense(lk[1], E, E)
        wv, bv = dense(lk[2], E, E)
        wo, bo = dense(lk[3], E, E)
        w1, b1 = dense(lk[4], E, F)
        w2, b2 = dense(lk[5], F, E)

        # fold the 1/sqrt(head_dim) attention scale into the Q projection
        wq = wq * scale
        bq = bq * scale

        wqkv_all.append(jnp.concatenate([wq, wk, wv], axis=1))      # (E, 3E)
        w1_all.append(w1)                                           # (E, FF)
        wout_all.append(jnp.concatenate([wo, w2], axis=0))          # (E+FF, E)

        ones = jnp.ones((E,), jnp.float32)
        zeros = jnp.zeros((E,), jnp.float32)
        bias_all.append(jnp.stack([
            jnp.concatenate([bq[0], bk[0], bv[0]]),                 # fused QKV bias (3E)
            row96(b1[0]), row96(bo[0]), row96(b2[0]),
            row96(ones), row96(zeros),                              # ln1 gamma / beta
            row96(ones), row96(zeros),                              # ln2 gamma / beta
        ], axis=0))                                                 # (8, 96)

    wf, bf = dense(keys[1 + L], E, E)
    wout_all.append(jnp.concatenate([wf, jnp.zeros((F, E), jnp.float32)], axis=0))
    bias_all.append(jnp.stack([row96(bf[0])]
                              + [jnp.zeros((BIAS_LANES,), jnp.float32)] * 7, axis=0))

    params["wqkv"] = jnp.stack(wqkv_all, 0).astype(jnp.bfloat16)    # (L, E, 3E)
    params["w1"] = jnp.stack(w1_all, 0).astype(jnp.bfloat16)        # (L, E, FF)
    params["wout"] = jnp.stack(wout_all, 0).astype(jnp.bfloat16)    # (L+1, E+FF, E)
    params["bias"] = jnp.stack(bias_all, 0)                         # (L+1, 8, 96) f32
    return params


if __name__ == "__main__":
    key = jax.random.PRNGKey(0)
    pkey, tkey = jax.random.split(key)
    params = init_params(pkey)
    src_tokens = jax.random.randint(tkey, (BATCH, SEQ), 0, VOCAB_SIZE, dtype=jnp.int32)
    out = transformer_encoder_jit(src_tokens, params)
    out = jax.block_until_ready(out)
    assert out.shape == (BATCH, SEQ, EMBED_SIZE)
    assert bool(jnp.all(jnp.isfinite(out)))
    print("KERNEL_OK")
</pallas_src>

<mosaic_0001>
module attributes {stable_mosaic.version = 11 : i64} {
  func.func @fused_encoder_kernel(%arg0: memref<16x32xf32, #tpu.memory_space<vmem>>, %arg1: memref<2x32x96xbf16, #tpu.memory_space<vmem>>, %arg2: memref<2x32x64xbf16, #tpu.memory_space<vmem>>, %arg3: memref<3x96x32xbf16, #tpu.memory_space<vmem>>, %arg4: memref<3x8x96xf32, #tpu.memory_space<vmem>>, %arg5: memref<16x32xf32, #tpu.memory_space<vmem>>) attributes {dimension_semantics = [], scalar_prefetch = 0 : i64, scratch_operands = 0 : i64, tpu.core_type = #tpu.core_type<tc>} {
    %c0 = arith.constant 0 : index
    %c0_0 = arith.constant 0 : index
    %0 = vector.load %arg0[%c0, %c0_0] : memref<16x32xf32, #tpu.memory_space<vmem>>, vector<16x32xf32>
    %c0_1 = arith.constant 0 : index
    %c0_2 = arith.constant 0 : index
    %c0_3 = arith.constant 0 : index
    %1 = vector.load %arg4[%c0_1, %c0_2, %c0_3] : memref<3x8x96xf32, #tpu.memory_space<vmem>>, vector<1x8x96xf32>
    %2 = vector.shape_cast %1 : vector<1x8x96xf32> to vector<8x96xf32>
    %3 = vector.extract_strided_slice %2 {offsets = [0, 0], sizes = [1, 96], strides = [1, 1]} : vector<8x96xf32> to vector<1x96xf32>
    %4 = vector.extract_strided_slice %2 {offsets = [1, 0], sizes = [1, 64], strides = [1, 1]} : vector<8x96xf32> to vector<1x64xf32>
    %5 = vector.extract_strided_slice %2 {offsets = [2, 0], sizes = [1, 32], strides = [1, 1]} : vector<8x96xf32> to vector<1x32xf32>
    %6 = vector.extract_strided_slice %2 {offsets = [3, 0], sizes = [1, 32], strides = [1, 1]} : vector<8x96xf32> to vector<1x32xf32>
    %7 = vector.extract_strided_slice %2 {offsets = [4, 0], sizes = [1, 32], strides = [1, 1]} : vector<8x96xf32> to vector<1x32xf32>
    %8 = vector.extract_strided_slice %2 {offsets = [5, 0], sizes = [1, 32], strides = [1, 1]} : vector<8x96xf32> to vector<1x32xf32>
    %9 = vector.extract_strided_slice %2 {offsets = [6, 0], sizes = [1, 32], strides = [1, 1]} : vector<8x96xf32> to vector<1x32xf32>
    %10 = vector.extract_strided_slice %2 {offsets = [7, 0], sizes = [1, 32], strides = [1, 1]} : vector<8x96xf32> to vector<1x32xf32>
    %c0_4 = arith.constant 0 : index
    %c0_5 = arith.constant 0 : index
    %c0_6 = arith.constant 0 : index
    %11 = vector.load %arg3[%c0_4, %c0_5, %c0_6] : memref<3x96x32xbf16, #tpu.memory_space<vmem>>, vector<1x96x32xbf16>
    %12 = vector.shape_cast %11 : vector<1x96x32xbf16> to vector<96x32xbf16>
    %13 = vector.extract_strided_slice %12 {offsets = [0, 0], sizes = [32, 32], strides = [1, 1]} : vector<96x32xbf16> to vector<32x32xbf16>
    %14 = vector.extract_strided_slice %12 {offsets = [32, 0], sizes = [64, 32], strides = [1, 1]} : vector<96x32xbf16> to vector<64x32xbf16>
    %15 = arith.truncf %0 : vector<16x32xf32> to vector<16x32xbf16>
    %c0_7 = arith.constant 0 : index
    %c0_8 = arith.constant 0 : index
    %c0_9 = arith.constant 0 : index
    %16 = vector.load %arg1[%c0_7, %c0_8, %c0_9] : memref<2x32x96xbf16, #tpu.memory_space<vmem>>, vector<1x32x96xbf16>
    %17 = vector.shape_cast %16 : vector<1x32x96xbf16> to vector<32x96xbf16>
    %cst = arith.constant dense<0.000000e+00> : vector<16x96xf32>
    %18 = tpu.matmul %15, %17, %cst {dimension_numbers = #tpu.dot_dimension_numbers<[1], [0], [0], [1], [0, 0, 1, 1], [], []>} : vector<16x32xbf16>, vector<32x96xbf16>, vector<16x96xf32> -> vector<16x96xf32>
    %19 = vector.broadcast %3 : vector<1x96xf32> to vector<16x96xf32>
    %20 = arith.addf %18, %19 : vector<16x96xf32>
    %21 = arith.truncf %20 : vector<16x96xf32> to vector<16x96xbf16>
    %22 = vector.extract_strided_slice %21 {offsets = [0, 0], sizes = [16, 8], strides = [1, 1]} : vector<16x96xbf16> to vector<16x8xbf16>
    %23 = vector.shape_cast %22 : vector<16x8xbf16> to vector<2x8x8xbf16>
    %24 = vector.extract_strided_slice %21 {offsets = [0, 32], sizes = [16, 8], strides = [1, 1]} : vector<16x96xbf16> to vector<16x8xbf16>
    %25 = vector.shape_cast %24 : vector<16x8xbf16> to vector<2x8x8xbf16>
    %26 = vector.extract_strided_slice %21 {offsets = [0, 64], sizes = [16, 8], strides = [1, 1]} : vector<16x96xbf16> to vector<16x8xbf16>
    %27 = vector.shape_cast %26 : vector<16x8xbf16> to vector<2x8x8xbf16>
    "tpu.trace_start"() <{level = 10 : i32, message = "bqd,bkd->bqk"}> : () -> ()
    %cst_10 = arith.constant dense<0.000000e+00> : vector<2x8x8xf32>
    %28 = tpu.matmul %23, %25, %cst_10 {dimension_numbers = #tpu.dot_dimension_numbers<[2], [2], [1], [1], [0, 0, 0, 1, 1, 1], [0], [0]>} : vector<2x8x8xbf16>, vector<2x8x8xbf16>, vector<2x8x8xf32> -> vector<2x8x8xf32>
    "tpu.trace_stop"() : () -> ()
    %cst_11 = arith.constant dense<0xFF800000> : vector<2x8xf32>
    %29 = vector.multi_reduction <maximumf>, %28, %cst_11 [2] : vector<2x8x8xf32> to vector<2x8xf32>
    %30 = vector.shape_cast %29 : vector<2x8xf32> to vector<2x8x1xf32>
    %31 = vector.broadcast %30 : vector<2x8x1xf32> to vector<2x8x8xf32>
    %32 = arith.subf %28, %31 : vector<2x8x8xf32>
    %33 = math.exp %32 : vector<2x8x8xf32>
    %cst_12 = arith.constant dense<0.000000e+00> : vector<2x8xf32>
    %34 = vector.multi_reduction <add>, %33, %cst_12 [2] : vector<2x8x8xf32> to vector<2x8xf32>
    %35 = vector.shape_cast %34 : vector<2x8xf32> to vector<2x8x1xf32>
    %36 = tpu.reciprocal %35 {approx = true} : vector<2x8x1xf32> -> vector<2x8x1xf32>
    %37 = vector.broadcast %36 : vector<2x8x1xf32> to vector<2x8x8xf32>
    %38 = arith.mulf %33, %37 : vector<2x8x8xf32>
    %39 = arith.truncf %38 : vector<2x8x8xf32> to vector<2x8x8xbf16>
    "tpu.trace_start"() <{level = 10 : i32, message = "bqk,bkd->bqd"}> : () -> ()
    %cst_13 = arith.constant dense<0.000000e+00> : vector<2x8x8xf32>
    %40 = tpu.matmul %39, %27, %cst_13 {dimension_numbers = #tpu.dot_dimension_numbers<[2], [1], [1], [2], [0, 0, 0, 1, 1, 2], [0], [0]>} : vector<2x8x8xbf16>, vector<2x8x8xbf16>, vector<2x8x8xf32> -> vector<2x8x8xf32>
    "tpu.trace_stop"() : () -> ()
    %41 = vector.shape_cast %40 : vector<2x8x8xf32> to vector<16x8xf32>
    %42 = vector.extract_strided_slice %21 {offsets = [0, 8], sizes = [16, 8], strides = [1, 1]} : vector<16x96xbf16> to vector<16x8xbf16>
    %43 = vector.shape_cast %42 : vector<16x8xbf16> to vector<2x8x8xbf16>
    %44 = vector.extract_strided_slice %21 {offsets = [0, 40], sizes = [16, 8], strides = [1, 1]} : vector<16x96xbf16> to vector<16x8xbf16>
    %45 = vector.shape_cast %44 : vector<16x8xbf16> to vector<2x8x8xbf16>
    %46 = vector.extract_strided_slice %21 {offsets = [0, 72], sizes = [16, 8], strides = [1, 1]} : vector<16x96xbf16> to vector<16x8xbf16>
    %47 = vector.shape_cast %46 : vector<16x8xbf16> to vector<2x8x8xbf16>
    "tpu.trace_start"() <{level = 10 : i32, message = "bqd,bkd->bqk"}> : () -> ()
    %cst_14 = arith.constant dense<0.000000e+00> : vector<2x8x8xf32>
    %48 = tpu.matmul %43, %45, %cst_14 {dimension_numbers = #tpu.dot_dimension_numbers<[2], [2], [1], [1], [0, 0, 0, 1, 1, 1], [0], [0]>} : vector<2x8x8xbf16>, vector<2x8x8xbf16>, vector<2x8x8xf32> -> vector<2x8x8xf32>
    "tpu.trace_stop"() : () -> ()
    %cst_15 = arith.constant dense<0xFF800000> : vector<2x8xf32>
    %49 = vector.multi_reduction <maximumf>, %48, %cst_15 [2] : vector<2x8x8xf32> to vector<2x8xf32>
    %50 = vector.shape_cast %49 : vector<2x8xf32> to vector<2x8x1xf32>
    %51 = vector.broadcast %50 : vector<2x8x1xf32> to vector<2x8x8xf32>
    %52 = arith.subf %48, %51 : vector<2x8x8xf32>
    %53 = math.exp %52 : vector<2x8x8xf32>
    %cst_16 = arith.constant dense<0.000000e+00> : vector<2x8xf32>
    %54 = vector.multi_reduction <add>, %53, %cst_16 [2] : vector<2x8x8xf32> to vector<2x8xf32>
    %55 = vector.shape_cast %54 : vector<2x8xf32> to vector<2x8x1xf32>
    %56 = tpu.reciprocal %55 {approx = true} : vector<2x8x1xf32> -> vector<2x8x1xf32>
    %57 = vector.broadcast %56 : vector<2x8x1xf32> to vector<2x8x8xf32>
    %58 = arith.mulf %53, %57 : vector<2x8x8xf32>
    %59 = arith.truncf %58 : vector<2x8x8xf32> to vector<2x8x8xbf16>
    "tpu.trace_start"() <{level = 10 : i32, message = "bqk,bkd->bqd"}> : () -> ()
    %cst_17 = arith.constant dense<0.000000e+00> : vector<2x8x8xf32>
    %60 = tpu.matmul %59, %47, %cst_17 {dimension_numbers = #tpu.dot_dimension_numbers<[2], [1], [1], [2], [0, 0, 0, 1, 1, 2], [0], [0]>} : vector<2x8x8xbf16>, vector<2x8x8xbf16>, vector<2x8x8xf32> -> vector<2x8x8xf32>
    "tpu.trace_stop"() : () -> ()
    %61 = vector.shape_cast %60 : vector<2x8x8xf32> to vector<16x8xf32>
    %62 = vector.extract_strided_slice %21 {offsets = [0, 16], sizes = [16, 8], strides = [1, 1]} : vector<16x96xbf16> to vector<16x8xbf16>
    %63 = vector.shape_cast %62 : vector<16x8xbf16> to vector<2x8x8xbf16>
    %64 = vector.extract_strided_slice %21 {offsets = [0, 48], sizes = [16, 8], strides = [1, 1]} : vector<16x96xbf16> to vector<16x8xbf16>
    %65 = vector.shape_cast %64 : vector<16x8xbf16> to vector<2x8x8xbf16>
    %66 = vector.extract_strided_slice %21 {offsets = [0, 80], sizes = [16, 8], strides = [1, 1]} : vector<16x96xbf16> to vector<16x8xbf16>
    %67 = vector.shape_cast %66 : vector<16x8xbf16> to vector<2x8x8xbf16>
    "tpu.trace_start"() <{level = 10 : i32, message = "bqd,bkd->bqk"}> : () -> ()
    %cst_18 = arith.constant dense<0.000000e+00> : vector<2x8x8xf32>
    %68 = tpu.matmul %63, %65, %cst_18 {dimension_numbers = #tpu.dot_dimension_numbers<[2], [2], [1], [1], [0, 0, 0, 1, 1, 1], [0], [0]>} : vector<2x8x8xbf16>, vector<2x8x8xbf16>, vector<2x8x8xf32> -> vector<2x8x8xf32>
    "tpu.trace_stop"() : () -> ()
    %cst_19 = arith.constant dense<0xFF800000> : vector<2x8xf32>
    %69 = vector.multi_reduction <maximumf>, %68, %cst_19 [2] : vector<2x8x8xf32> to vector<2x8xf32>
    %70 = vector.shape_cast %69 : vector<2x8xf32> to vector<2x8x1xf32>
    %71 = vector.broadcast %70 : vector<2x8x1xf32> to vector<2x8x8xf32>
    %72 = arith.subf %68, %71 : vector<2x8x8xf32>
    %73 = math.exp %72 : vector<2x8x8xf32>
    %cst_20 = arith.constant dense<0.000000e+00> : vector<2x8xf32>
    %74 = vector.multi_reduction <add>, %73, %cst_20 [2] : vector<2x8x8xf32> to vector<2x8xf32>
    %75 = vector.shape_cast %74 : vector<2x8xf32> to vector<2x8x1xf32>
    %76 = tpu.reciprocal %75 {approx = true} : vector<2x8x1xf32> -> vector<2x8x1xf32>
    %77 = vector.broadcast %76 : vector<2x8x1xf32> to vector<2x8x8xf32>
    %78 = arith.mulf %73, %77 : vector<2x8x8xf32>
    %79 = arith.truncf %78 : vector<2x8x8xf32> to vector<2x8x8xbf16>
    "tpu.trace_start"() <{level = 10 : i32, message = "bqk,bkd->bqd"}> : () -> ()
    %cst_21 = arith.constant dense<0.000000e+00> : vector<2x8x8xf32>
    %80 = tpu.matmul %79, %67, %cst_21 {dimension_numbers = #tpu.dot_dimension_numbers<[2], [1], [1], [2], [0, 0, 0, 1, 1, 2], [0], [0]>} : vector<2x8x8xbf16>, vector<2x8x8xbf16>, vector<2x8x8xf32> -> vector<2x8x8xf32>
    "tpu.trace_stop"() : () -> ()
    %81 = vector.shape_cast %80 : vector<2x8x8xf32> to vector<16x8xf32>
    %82 = vector.extract_strided_slice %21 {offsets = [0, 24], sizes = [16, 8], strides = [1, 1]} : vector<16x96xbf16> to vector<16x8xbf16>
    %83 = vector.shape_cast %82 : vector<16x8xbf16> to vector<2x8x8xbf16>
    %84 = vector.extract_strided_slice %21 {offsets = [0, 56], sizes = [16, 8], strides = [1, 1]} : vector<16x96xbf16> to vector<16x8xbf16>
    %85 = vector.shape_cast %84 : vector<16x8xbf16> to vector<2x8x8xbf16>
    %86 = vector.extract_strided_slice %21 {offsets = [0, 88], sizes = [16, 8], strides = [1, 1]} : vector<16x96xbf16> to vector<16x8xbf16>
    %87 = vector.shape_cast %86 : vector<16x8xbf16> to vector<2x8x8xbf16>
    "tpu.trace_start"() <{level = 10 : i32, message = "bqd,bkd->bqk"}> : () -> ()
    %cst_22 = arith.constant dense<0.000000e+00> : vector<2x8x8xf32>
    %88 = tpu.matmul %83, %85, %cst_22 {dimension_numbers = #tpu.dot_dimension_numbers<[2], [2], [1], [1], [0, 0, 0, 1, 1, 1], [0], [0]>} : vector<2x8x8xbf16>, vector<2x8x8xbf16>, vector<2x8x8xf32> -> vector<2x8x8xf32>
    "tpu.trace_stop"() : () -> ()
    %cst_23 = arith.constant dense<0xFF800000> : vector<2x8xf32>
    %89 = vector.multi_reduction <maximumf>, %88, %cst_23 [2] : vector<2x8x8xf32> to vector<2x8xf32>
    %90 = vector.shape_cast %89 : vector<2x8xf32> to vector<2x8x1xf32>
    %91 = vector.broadcast %90 : vector<2x8x1xf32> to vector<2x8x8xf32>
    %92 = arith.subf %88, %91 : vector<2x8x8xf32>
    %93 = math.exp %92 : vector<2x8x8xf32>
    %cst_24 = arith.constant dense<0.000000e+00> : vector<2x8xf32>
    %94 = vector.multi_reduction <add>, %93, %cst_24 [2] : vector<2x8x8xf32> to vector<2x8xf32>
    %95 = vector.shape_cast %94 : vector<2x8xf32> to vector<2x8x1xf32>
    %96 = tpu.reciprocal %95 {approx = true} : vector<2x8x1xf32> -> vector<2x8x1xf32>
    %97 = vector.broadcast %96 : vector<2x8x1xf32> to vector<2x8x8xf32>
    %98 = arith.mulf %93, %97 : vector<2x8x8xf32>
    %99 = arith.truncf %98 : vector<2x8x8xf32> to vector<2x8x8xbf16>
    "tpu.trace_start"() <{level = 10 : i32, message = "bqk,bkd->bqd"}> : () -> ()
    %cst_25 = arith.constant dense<0.000000e+00> : vector<2x8x8xf32>
    %100 = tpu.matmul %99, %87, %cst_25 {dimension_numbers = #tpu.dot_dimension_numbers<[2], [1], [1], [2], [0, 0, 0, 1, 1, 2], [0], [0]>} : vector<2x8x8xbf16>, vector<2x8x8xbf16>, vector<2x8x8xf32> -> vector<2x8x8xf32>
    "tpu.trace_stop"() : () -> ()
    %101 = vector.shape_cast %100 : vector<2x8x8xf32> to vector<16x8xf32>
    %102 = tpu.concatenate %41, %61, %81, %101 in 1 : vector<16x8xf32>, vector<16x8xf32>, vector<16x8xf32>, vector<16x8xf32> -> vector<16x32xf32>
    %103 = arith.truncf %102 : vector<16x32xf32> to vector<16x32xbf16>
    %cst_26 = arith.constant dense<0.000000e+00> : vector<16x32xf32>
    %104 = tpu.matmul %103, %13, %cst_26 {dimension_numbers = #tpu.dot_dimension_numbers<[1], [0], [0], [1], [0, 0, 1, 1], [], []>} : vector<16x32xbf16>, vector<32x32xbf16>, vector<16x32xf32> -> vector<16x32xf32>
    %105 = vector.broadcast %5 : vector<1x32xf32> to vector<16x32xf32>
    %106 = arith.addf %104, %105 : vector<16x32xf32>
    %107 = arith.addf %0, %106 : vector<16x32xf32>
    %cst_27 = arith.constant dense<0.000000e+00> : vector<16xf32>
    %108 = vector.multi_reduction <add>, %107, %cst_27 [1] : vector<16x32xf32> to vector<16xf32>
    %109 = vector.shape_cast %108 : vector<16xf32> to vector<16x1xf32>
    %cst_28 = arith.constant 3.200000e+01 : f32
    %110 = vector.broadcast %cst_28 : f32 to vector<16x1xf32>
    %111 = arith.divf %109, %110 : vector<16x1xf32>
    %112 = vector.broadcast %111 : vector<16x1xf32> to vector<16x32xf32>
    %113 = arith.subf %107, %112 : vector<16x32xf32>
    %114 = arith.mulf %113, %113 : vector<16x32xf32>
    %cst_29 = arith.constant dense<0.000000e+00> : vector<16xf32>
    %115 = vector.multi_reduction <add>, %114, %cst_29 [1] : vector<16x32xf32> to vector<16xf32>
    %116 = vector.shape_cast %115 : vector<16xf32> to vector<16x1xf32>
    %cst_30 = arith.constant 3.200000e+01 : f32
    %117 = vector.broadcast %cst_30 : f32 to vector<16x1xf32>
    %118 = arith.divf %116, %117 : vector<16x1xf32>
    %119 = vector.broadcast %111 : vector<16x1xf32> to vector<16x32xf32>
    %120 = arith.subf %107, %119 : vector<16x32xf32>
    %cst_31 = arith.constant 9.99999974E-6 : f32
    %121 = vector.broadcast %cst_31 : f32 to vector<16x1xf32>
    %122 = arith.addf %118, %121 : vector<16x1xf32>
    %123 = math.rsqrt %122 : vector<16x1xf32>
    %124 = vector.broadcast %123 : vector<16x1xf32> to vector<16x32xf32>
    %125 = arith.mulf %120, %124 : vector<16x32xf32>
    %126 = vector.broadcast %7 : vector<1x32xf32> to vector<16x32xf32>
    %127 = arith.mulf %125, %126 : vector<16x32xf32>
    %128 = vector.broadcast %8 : vector<1x32xf32> to vector<16x32xf32>
    %129 = arith.addf %127, %128 : vector<16x32xf32>
    %130 = arith.truncf %129 : vector<16x32xf32> to vector<16x32xbf16>
    %c0_32 = arith.constant 0 : index
    %c0_33 = arith.constant 0 : index
    %c0_34 = arith.constant 0 : index
    %131 = vector.load %arg2[%c0_32, %c0_33, %c0_34] : memref<2x32x64xbf16, #tpu.memory_space<vmem>>, vector<1x32x64xbf16>
    %132 = vector.shape_cast %131 : vector<1x32x64xbf16> to vector<32x64xbf16>
    %cst_35 = arith.constant dense<0.000000e+00> : vector<16x64xf32>
    %133 = tpu.matmul %130, %132, %cst_35 {dimension_numbers = #tpu.dot_dimension_numbers<[1], [0], [0], [1], [0, 0, 1, 1], [], []>} : vector<16x32xbf16>, vector<32x64xbf16>, vector<16x64xf32> -> vector<16x64xf32>
    %134 = vector.broadcast %4 : vector<1x64xf32> to vector<16x64xf32>
    %135 = arith.addf %133, %134 : vector<16x64xf32>
    %cst_36 = arith.constant 0.000000e+00 : f32
    %136 = vector.broadcast %cst_36 : f32 to vector<16x64xf32>
    %137 = arith.maximumf %135, %136 : vector<16x64xf32>
    %138 = arith.truncf %137 : vector<16x64xf32> to vector<16x64xbf16>
    %cst_37 = arith.constant dense<0.000000e+00> : vector<16x32xf32>
    %139 = tpu.matmul %138, %14, %cst_37 {dimension_numbers = #tpu.dot_dimension_numbers<[1], [0], [0], [1], [0, 0, 1, 1], [], []>} : vector<16x64xbf16>, vector<64x32xbf16>, vector<16x32xf32> -> vector<16x32xf32>
    %140 = vector.broadcast %6 : vector<1x32xf32> to vector<16x32xf32>
    %141 = arith.addf %139, %140 : vector<16x32xf32>
    %142 = arith.addf %129, %141 : vector<16x32xf32>
    %cst_38 = arith.constant dense<0.000000e+00> : vector<16xf32>
    %143 = vector.multi_reduction <add>, %142, %cst_38 [1] : vector<16x32xf32> to vector<16xf32>
    %144 = vector.shape_cast %143 : vector<16xf32> to vector<16x1xf32>
    %cst_39 = arith.constant 3.200000e+01 : f32
    %145 = vector.broadcast %cst_39 : f32 to vector<16x1xf32>
    %146 = arith.divf %144, %145 : vector<16x1xf32>
    %147 = vector.broadcast %146 : vector<16x1xf32> to vector<16x32xf32>
    %148 = arith.subf %142, %147 : vector<16x32xf32>
    %149 = arith.mulf %148, %148 : vector<16x32xf32>
    %cst_40 = arith.constant dense<0.000000e+00> : vector<16xf32>
    %150 = vector.multi_reduction <add>, %149, %cst_40 [1] : vector<16x32xf32> to vector<16xf32>
    %151 = vector.shape_cast %150 : vector<16xf32> to vector<16x1xf32>
    %cst_41 = arith.constant 3.200000e+01 : f32
    %152 = vector.broadcast %cst_41 : f32 to vector<16x1xf32>
    %153 = arith.divf %151, %152 : vector<16x1xf32>
    %154 = vector.broadcast %146 : vector<16x1xf32> to vector<16x32xf32>
    %155 = arith.subf %142, %154 : vector<16x32xf32>
    %cst_42 = arith.constant 9.99999974E-6 : f32
    %156 = vector.broadcast %cst_42 : f32 to vector<16x1xf32>
    %157 = arith.addf %153, %156 : vector<16x1xf32>
    %158 = math.rsqrt %157 : vector<16x1xf32>
    %159 = vector.broadcast %158 : vector<16x1xf32> to vector<16x32xf32>
    %160 = arith.mulf %155, %159 : vector<16x32xf32>
    %161 = vector.broadcast %9 : vector<1x32xf32> to vector<16x32xf32>
    %162 = arith.mulf %160, %161 : vector<16x32xf32>
    %163 = vector.broadcast %10 : vector<1x32xf32> to vector<16x32xf32>
    %164 = arith.addf %162, %163 : vector<16x32xf32>
    %c1 = arith.constant 1 : index
    %c0_43 = arith.constant 0 : index
    %c0_44 = arith.constant 0 : index
    %165 = vector.load %arg4[%c1, %c0_43, %c0_44] : memref<3x8x96xf32, #tpu.memory_space<vmem>>, vector<1x8x96xf32>
    %166 = vector.shape_cast %165 : vector<1x8x96xf32> to vector<8x96xf32>
    %167 = vector.extract_strided_slice %166 {offsets = [0, 0], sizes = [1, 96], strides = [1, 1]} : vector<8x96xf32> to vector<1x96xf32>
    %168 = vector.extract_strided_slice %166 {offsets = [1, 0], sizes = [1, 64], strides = [1, 1]} : vector<8x96xf32> to vector<1x64xf32>
    %169 = vector.extract_strided_slice %166 {offsets = [2, 0], sizes = [1, 32], strides = [1, 1]} : vector<8x96xf32> to vector<1x32xf32>
    %170 = vector.extract_strided_slice %166 {offsets = [3, 0], sizes = [1, 32], strides = [1, 1]} : vector<8x96xf32> to vector<1x32xf32>
    %171 = vector.extract_strided_slice %166 {offsets = [4, 0], sizes = [1, 32], strides = [1, 1]} : vector<8x96xf32> to vector<1x32xf32>
    %172 = vector.extract_strided_slice %166 {offsets = [5, 0], sizes = [1, 32], strides = [1, 1]} : vector<8x96xf32> to vector<1x32xf32>
    %173 = vector.extract_strided_slice %166 {offsets = [6, 0], sizes = [1, 32], strides = [1, 1]} : vector<8x96xf32> to vector<1x32xf32>
    %174 = vector.extract_strided_slice %166 {offsets = [7, 0], sizes = [1, 32], strides = [1, 1]} : vector<8x96xf32> to vector<1x32xf32>
    %c1_45 = arith.constant 1 : index
    %c0_46 = arith.constant 0 : index
    %c0_47 = arith.constant 0 : index
    %175 = vector.load %arg3[%c1_45, %c0_46, %c0_47] : memref<3x96x32xbf16, #tpu.memory_space<vmem>>, vector<1x96x32xbf16>
    %176 = vector.shape_cast %175 : vector<1x96x32xbf16> to vector<96x32xbf16>
    %177 = vector.extract_strided_slice %176 {offsets = [0, 0], sizes = [32, 32], strides = [1, 1]} : vector<96x32xbf16> to vector<32x32xbf16>
    %178 = vector.extract_strided_slice %176 {offsets = [32, 0], sizes = [64, 32], strides = [1, 1]} : vector<96x32xbf16> to vector<64x32xbf16>
    %179 = arith.truncf %164 : vector<16x32xf32> to vector<16x32xbf16>
    %c1_48 = arith.constant 1 : index
    %c0_49 = arith.constant 0 : index
    %c0_50 = arith.constant 0 : index
    %180 = vector.load %arg1[%c1_48, %c0_49, %c0_50] : memref<2x32x96xbf16, #tpu.memory_space<vmem>>, vector<1x32x96xbf16>
    %181 = vector.shape_cast %180 : vector<1x32x96xbf16> to vector<32x96xbf16>
    %cst_51 = arith.constant dense<0.000000e+00> : vector<16x96xf32>
    %182 = tpu.matmul %179, %181, %cst_51 {dimension_numbers = #tpu.dot_dimension_numbers<[1], [0], [0], [1], [0, 0, 1, 1], [], []>} : vector<16x32xbf16>, vector<32x96xbf16>, vector<16x96xf32> -> vector<16x96xf32>
    %183 = vector.broadcast %167 : vector<1x96xf32> to vector<16x96xf32>
    %184 = arith.addf %182, %183 : vector<16x96xf32>
    %185 = arith.truncf %184 : vector<16x96xf32> to vector<16x96xbf16>
    %186 = vector.extract_strided_slice %185 {offsets = [0, 0], sizes = [16, 8], strides = [1, 1]} : vector<16x96xbf16> to vector<16x8xbf16>
    %187 = vector.shape_cast %186 : vector<16x8xbf16> to vector<2x8x8xbf16>
    %188 = vector.extract_strided_slice %185 {offsets = [0, 32], sizes = [16, 8], strides = [1, 1]} : vector<16x96xbf16> to vector<16x8xbf16>
    %189 = vector.shape_cast %188 : vector<16x8xbf16> to vector<2x8x8xbf16>
    %190 = vector.extract_strided_slice %185 {offsets = [0, 64], sizes = [16, 8], strides = [1, 1]} : vector<16x96xbf16> to vector<16x8xbf16>
    %191 = vector.shape_cast %190 : vector<16x8xbf16> to vector<2x8x8xbf16>
    "tpu.trace_start"() <{level = 10 : i32, message = "bqd,bkd->bqk"}> : () -> ()
    %cst_52 = arith.constant dense<0.000000e+00> : vector<2x8x8xf32>
    %192 = tpu.matmul %187, %189, %cst_52 {dimension_numbers = #tpu.dot_dimension_numbers<[2], [2], [1], [1], [0, 0, 0, 1, 1, 1], [0], [0]>} : vector<2x8x8xbf16>, vector<2x8x8xbf16>, vector<2x8x8xf32> -> vector<2x8x8xf32>
    "tpu.trace_stop"() : () -> ()
    %cst_53 = arith.constant dense<0xFF800000> : vector<2x8xf32>
    %193 = vector.multi_reduction <maximumf>, %192, %cst_53 [2] : vector<2x8x8xf32> to vector<2x8xf32>
    %194 = vector.shape_cast %193 : vector<2x8xf32> to vector<2x8x1xf32>
    %195 = vector.broadcast %194 : vector<2x8x1xf32> to vector<2x8x8xf32>
    %196 = arith.subf %192, %195 : vector<2x8x8xf32>
    %197 = math.exp %196 : vector<2x8x8xf32>
    %cst_54 = arith.constant dense<0.000000e+00> : vector<2x8xf32>
    %198 = vector.multi_reduction <add>, %197, %cst_54 [2] : vector<2x8x8xf32> to vector<2x8xf32>
    %199 = vector.shape_cast %198 : vector<2x8xf32> to vector<2x8x1xf32>
    %200 = tpu.reciprocal %199 {approx = true} : vector<2x8x1xf32> -> vector<2x8x1xf32>
    %201 = vector.broadcast %200 : vector<2x8x1xf32> to vector<2x8x8xf32>
    %202 = arith.mulf %197, %201 : vector<2x8x8xf32>
    %203 = arith.truncf %202 : vector<2x8x8xf32> to vector<2x8x8xbf16>
    "tpu.trace_start"() <{level = 10 : i32, message = "bqk,bkd->bqd"}> : () -> ()
    %cst_55 = arith.constant dense<0.000000e+00> : vector<2x8x8xf32>
    %204 = tpu.matmul %203, %191, %cst_55 {dimension_numbers = #tpu.dot_dimension_numbers<[2], [1], [1], [2], [0, 0, 0, 1, 1, 2], [0], [0]>} : vector<2x8x8xbf16>, vector<2x8x8xbf16>, vector<2x8x8xf32> -> vector<2x8x8xf32>
    "tpu.trace_stop"() : () -> ()
    %205 = vector.shape_cast %204 : vector<2x8x8xf32> to vector<16x8xf32>
    %206 = vector.extract_strided_slice %185 {offsets = [0, 8], sizes = [16, 8], strides = [1, 1]} : vector<16x96xbf16> to vector<16x8xbf16>
    %207 = vector.shape_cast %206 : vector<16x8xbf16> to vector<2x8x8xbf16>
    %208 = vector.extract_strided_slice %185 {offsets = [0, 40], sizes = [16, 8], strides = [1, 1]} : vector<16x96xbf16> to vector<16x8xbf16>
    %209 = vector.shape_cast %208 : vector<16x8xbf16> to vector<2x8x8xbf16>
    %210 = vector.extract_strided_slice %185 {offsets = [0, 72], sizes = [16, 8], strides = [1, 1]} : vector<16x96xbf16> to vector<16x8xbf16>
    %211 = vector.shape_cast %210 : vector<16x8xbf16> to vector<2x8x8xbf16>
    "tpu.trace_start"() <{level = 10 : i32, message = "bqd,bkd->bqk"}> : () -> ()
    %cst_56 = arith.constant dense<0.000000e+00> : vector<2x8x8xf32>
    %212 = tpu.matmul %207, %209, %cst_56 {dimension_numbers = #tpu.dot_dimension_numbers<[2], [2], [1], [1], [0, 0, 0, 1, 1, 1], [0], [0]>} : vector<2x8x8xbf16>, vector<2x8x8xbf16>, vector<2x8x8xf32> -> vector<2x8x8xf32>
    "tpu.trace_stop"() : () -> ()
    %cst_57 = arith.constant dense<0xFF800000> : vector<2x8xf32>
    %213 = vector.multi_reduction <maximumf>, %212, %cst_57 [2] : vector<2x8x8xf32> to vector<2x8xf32>
    %214 = vector.shape_cast %213 : vector<2x8xf32> to vector<2x8x1xf32>
    %215 = vector.broadcast %214 : vector<2x8x1xf32> to vector<2x8x8xf32>
    %216 = arith.subf %212, %215 : vector<2x8x8xf32>
    %217 = math.exp %216 : vector<2x8x8xf32>
    %cst_58 = arith.constant dense<0.000000e+00> : vector<2x8xf32>
    %218 = vector.multi_reduction <add>, %217, %cst_58 [2] : vector<2x8x8xf32> to vector<2x8xf32>
    %219 = vector.shape_cast %218 : vector<2x8xf32> to vector<2x8x1xf32>
    %220 = tpu.reciprocal %219 {approx = true} : vector<2x8x1xf32> -> vector<2x8x1xf32>
    %221 = vector.broadcast %220 : vector<2x8x1xf32> to vector<2x8x8xf32>
    %222 = arith.mulf %217, %221 : vector<2x8x8xf32>
    %223 = arith.truncf %222 : vector<2x8x8xf32> to vector<2x8x8xbf16>
    "tpu.trace_start"() <{level = 10 : i32, message = "bqk,bkd->bqd"}> : () -> ()
    %cst_59 = arith.constant dense<0.000000e+00> : vector<2x8x8xf32>
    %224 = tpu.matmul %223, %211, %cst_59 {dimension_numbers = #tpu.dot_dimension_numbers<[2], [1], [1], [2], [0, 0, 0, 1, 1, 2], [0], [0]>} : vector<2x8x8xbf16>, vector<2x8x8xbf16>, vector<2x8x8xf32> -> vector<2x8x8xf32>
    "tpu.trace_stop"() : () -> ()
    %225 = vector.shape_cast %224 : vector<2x8x8xf32> to vector<16x8xf32>
    %226 = vector.extract_strided_slice %185 {offsets = [0, 16], sizes = [16, 8], strides = [1, 1]} : vector<16x96xbf16> to vector<16x8xbf16>
    %227 = vector.shape_cast %226 : vector<16x8xbf16> to vector<2x8x8xbf16>
    %228 = vector.extract_strided_slice %185 {offsets = [0, 48], sizes = [16, 8], strides = [1, 1]} : vector<16x96xbf16> to vector<16x8xbf16>
    %229 = vector.shape_cast %228 : vector<16x8xbf16> to vector<2x8x8xbf16>
    %230 = vector.extract_strided_slice %185 {offsets = [0, 80], sizes = [16, 8], strides = [1, 1]} : vector<16x96xbf16> to vector<16x8xbf16>
    %231 = vector.shape_cast %230 : vector<16x8xbf16> to vector<2x8x8xbf16>
    "tpu.trace_start"() <{level = 10 : i32, message = "bqd,bkd->bqk"}> : () -> ()
    %cst_60 = arith.constant dense<0.000000e+00> : vector<2x8x8xf32>
    %232 = tpu.matmul %227, %229, %cst_60 {dimension_numbers = #tpu.dot_dimension_numbers<[2], [2], [1], [1], [0, 0, 0, 1, 1, 1], [0], [0]>} : vector<2x8x8xbf16>, vector<2x8x8xbf16>, vector<2x8x8xf32> -> vector<2x8x8xf32>
    "tpu.trace_stop"() : () -> ()
    %cst_61 = arith.constant dense<0xFF800000> : vector<2x8xf32>
    %233 = vector.multi_reduction <maximumf>, %232, %cst_61 [2] : vector<2x8x8xf32> to vector<2x8xf32>
    %234 = vector.shape_cast %233 : vector<2x8xf32> to vector<2x8x1xf32>
    %235 = vector.broadcast %234 : vector<2x8x1xf32> to vector<2x8x8xf32>
    %236 = arith.subf %232, %235 : vector<2x8x8xf32>
    %237 = math.exp %236 : vector<2x8x8xf32>
    %cst_62 = arith.constant dense<0.000000e+00> : vector<2x8xf32>
    %238 = vector.multi_reduction <add>, %237, %cst_62 [2] : vector<2x8x8xf32> to vector<2x8xf32>
    %239 = vector.shape_cast %238 : vector<2x8xf32> to vector<2x8x1xf32>
    %240 = tpu.reciprocal %239 {approx = true} : vector<2x8x1xf32> -> vector<2x8x1xf32>
    %241 = vector.broadcast %240 : vector<2x8x1xf32> to vector<2x8x8xf32>
    %242 = arith.mulf %237, %241 : vector<2x8x8xf32>
    %243 = arith.truncf %242 : vector<2x8x8xf32> to vector<2x8x8xbf16>
    "tpu.trace_start"() <{level = 10 : i32, message = "bqk,bkd->bqd"}> : () -> ()
    %cst_63 = arith.constant dense<0.000000e+00> : vector<2x8x8xf32>
    %244 = tpu.matmul %243, %231, %cst_63 {dimension_numbers = #tpu.dot_dimension_numbers<[2], [1], [1], [2], [0, 0, 0, 1, 1, 2], [0], [0]>} : vector<2x8x8xbf16>, vector<2x8x8xbf16>, vector<2x8x8xf32> -> vector<2x8x8xf32>
    "tpu.trace_stop"() : () -> ()
    %245 = vector.shape_cast %244 : vector<2x8x8xf32> to vector<16x8xf32>
    %246 = vector.extract_strided_slice %185 {offsets = [0, 24], sizes = [16, 8], strides = [1, 1]} : vector<16x96xbf16> to vector<16x8xbf16>
    %247 = vector.shape_cast %246 : vector<16x8xbf16> to vector<2x8x8xbf16>
    %248 = vector.extract_strided_slice %185 {offsets = [0, 56], sizes = [16, 8], strides = [1, 1]} : vector<16x96xbf16> to vector<16x8xbf16>
    %249 = vector.shape_cast %248 : vector<16x8xbf16> to vector<2x8x8xbf16>
    %250 = vector.extract_strided_slice %185 {offsets = [0, 88], sizes = [16, 8], strides = [1, 1]} : vector<16x96xbf16> to vector<16x8xbf16>
    %251 = vector.shape_cast %250 : vector<16x8xbf16> to vector<2x8x8xbf16>
    "tpu.trace_start"() <{level = 10 : i32, message = "bqd,bkd->bqk"}> : () -> ()
    %cst_64 = arith.constant dense<0.000000e+00> : vector<2x8x8xf32>
    %252 = tpu.matmul %247, %249, %cst_64 {dimension_numbers = #tpu.dot_dimension_numbers<[2], [2], [1], [1], [0, 0, 0, 1, 1, 1], [0], [0]>} : vector<2x8x8xbf16>, vector<2x8x8xbf16>, vector<2x8x8xf32> -> vector<2x8x8xf32>
    "tpu.trace_stop"() : () -> ()
    %cst_65 = arith.constant dense<0xFF800000> : vector<2x8xf32>
    %253 = vector.multi_reduction <maximumf>, %252, %cst_65 [2] : vector<2x8x8xf32> to vector<2x8xf32>
    %254 = vector.shape_cast %253 : vector<2x8xf32> to vector<2x8x1xf32>
    %255 = vector.broadcast %254 : vector<2x8x1xf32> to vector<2x8x8xf32>
    %256 = arith.subf %252, %255 : vector<2x8x8xf32>
    %257 = math.exp %256 : vector<2x8x8xf32>
    %cst_66 = arith.constant dense<0.000000e+00> : vector<2x8xf32>
    %258 = vector.multi_reduction <add>, %257, %cst_66 [2] : vector<2x8x8xf32> to vector<2x8xf32>
    %259 = vector.shape_cast %258 : vector<2x8xf32> to vector<2x8x1xf32>
    %260 = tpu.reciprocal %259 {approx = true} : vector<2x8x1xf32> -> vector<2x8x1xf32>
    %261 = vector.broadcast %260 : vector<2x8x1xf32> to vector<2x8x8xf32>
    %262 = arith.mulf %257, %261 : vector<2x8x8xf32>
    %263 = arith.truncf %262 : vector<2x8x8xf32> to vector<2x8x8xbf16>
    "tpu.trace_start"() <{level = 10 : i32, message = "bqk,bkd->bqd"}> : () -> ()
    %cst_67 = arith.constant dense<0.000000e+00> : vector<2x8x8xf32>
    %264 = tpu.matmul %263, %251, %cst_67 {dimension_numbers = #tpu.dot_dimension_numbers<[2], [1], [1], [2], [0, 0, 0, 1, 1, 2], [0], [0]>} : vector<2x8x8xbf16>, vector<2x8x8xbf16>, vector<2x8x8xf32> -> vector<2x8x8xf32>
    "tpu.trace_stop"() : () -> ()
    %265 = vector.shape_cast %264 : vector<2x8x8xf32> to vector<16x8xf32>
    %266 = tpu.concatenate %205, %225, %245, %265 in 1 : vector<16x8xf32>, vector<16x8xf32>, vector<16x8xf32>, vector<16x8xf32> -> vector<16x32xf32>
    %267 = arith.truncf %266 : vector<16x32xf32> to vector<16x32xbf16>
    %cst_68 = arith.constant dense<0.000000e+00> : vector<16x32xf32>
    %268 = tpu.matmul %267, %177, %cst_68 {dimension_numbers = #tpu.dot_dimension_numbers<[1], [0], [0], [1], [0, 0, 1, 1], [], []>} : vector<16x32xbf16>, vector<32x32xbf16>, vector<16x32xf32> -> vector<16x32xf32>
    %269 = vector.broadcast %169 : vector<1x32xf32> to vector<16x32xf32>
    %270 = arith.addf %268, %269 : vector<16x32xf32>
    %271 = arith.addf %164, %270 : vector<16x32xf32>
    %cst_69 = arith.constant dense<0.000000e+00> : vector<16xf32>
    %272 = vector.multi_reduction <add>, %271, %cst_69 [1] : vector<16x32xf32> to vector<16xf32>
    %273 = vector.shape_cast %272 : vector<16xf32> to vector<16x1xf32>
    %cst_70 = arith.constant 3.200000e+01 : f32
    %274 = vector.broadcast %cst_70 : f32 to vector<16x1xf32>
    %275 = arith.divf %273, %274 : vector<16x1xf32>
    %276 = vector.broadcast %275 : vector<16x1xf32> to vector<16x32xf32>
    %277 = arith.subf %271, %276 : vector<16x32xf32>
    %278 = arith.mulf %277, %277 : vector<16x32xf32>
    %cst_71 = arith.constant dense<0.000000e+00> : vector<16xf32>
    %279 = vector.multi_reduction <add>, %278, %cst_71 [1] : vector<16x32xf32> to vector<16xf32>
    %280 = vector.shape_cast %279 : vector<16xf32> to vector<16x1xf32>
    %cst_72 = arith.constant 3.200000e+01 : f32
    %281 = vector.broadcast %cst_72 : f32 to vector<16x1xf32>
    %282 = arith.divf %280, %281 : vector<16x1xf32>
    %283 = vector.broadcast %275 : vector<16x1xf32> to vector<16x32xf32>
    %284 = arith.subf %271, %283 : vector<16x32xf32>
    %cst_73 = arith.constant 9.99999974E-6 : f32
    %285 = vector.broadcast %cst_73 : f32 to vector<16x1xf32>
    %286 = arith.addf %282, %285 : vector<16x1xf32>
    %287 = math.rsqrt %286 : vector<16x1xf32>
    %288 = vector.broadcast %287 : vector<16x1xf32> to vector<16x32xf32>
    %289 = arith.mulf %284, %288 : vector<16x32xf32>
    %290 = vector.broadcast %171 : vector<1x32xf32> to vector<16x32xf32>
    %291 = arith.mulf %289, %290 : vector<16x32xf32>
    %292 = vector.broadcast %172 : vector<1x32xf32> to vector<16x32xf32>
    %293 = arith.addf %291, %292 : vector<16x32xf32>
    %294 = arith.truncf %293 : vector<16x32xf32> to vector<16x32xbf16>
    %c1_74 = arith.constant 1 : index
    %c0_75 = arith.constant 0 : index
    %c0_76 = arith.constant 0 : index
    %295 = vector.load %arg2[%c1_74, %c0_75, %c0_76] : memref<2x32x64xbf16, #tpu.memory_space<vmem>>, vector<1x32x64xbf16>
    %296 = vector.shape_cast %295 : vector<1x32x64xbf16> to vector<32x64xbf16>
    %cst_77 = arith.constant dense<0.000000e+00> : vector<16x64xf32>
    %297 = tpu.matmul %294, %296, %cst_77 {dimension_numbers = #tpu.dot_dimension_numbers<[1], [0], [0], [1], [0, 0, 1, 1], [], []>} : vector<16x32xbf16>, vector<32x64xbf16>, vector<16x64xf32> -> vector<16x64xf32>
    %298 = vector.broadcast %168 : vector<1x64xf32> to vector<16x64xf32>
    %299 = arith.addf %297, %298 : vector<16x64xf32>
    %cst_78 = arith.constant 0.000000e+00 : f32
    %300 = vector.broadcast %cst_78 : f32 to vector<16x64xf32>
    %301 = arith.maximumf %299, %300 : vector<16x64xf32>
    %302 = arith.truncf %301 : vector<16x64xf32> to vector<16x64xbf16>
    %cst_79 = arith.constant dense<0.000000e+00> : vector<16x32xf32>
    %303 = tpu.matmul %302, %178, %cst_79 {dimension_numbers = #tpu.dot_dimension_numbers<[1], [0], [0], [1], [0, 0, 1, 1], [], []>} : vector<16x64xbf16>, vector<64x32xbf16>, vector<16x32xf32> -> vector<16x32xf32>
    %304 = vector.broadcast %170 : vector<1x32xf32> to vector<16x32xf32>
    %305 = arith.addf %303, %304 : vector<16x32xf32>
    %306 = arith.addf %293, %305 : vector<16x32xf32>
    %cst_80 = arith.constant dense<0.000000e+00> : vector<16xf32>
    %307 = vector.multi_reduction <add>, %306, %cst_80 [1] : vector<16x32xf32> to vector<16xf32>
    %308 = vector.shape_cast %307 : vector<16xf32> to vector<16x1xf32>
    %cst_81 = arith.constant 3.200000e+01 : f32
    %309 = vector.broadcast %cst_81 : f32 to vector<16x1xf32>
    %310 = arith.divf %308, %309 : vector<16x1xf32>
    %311 = vector.broadcast %310 : vector<16x1xf32> to vector<16x32xf32>
    %312 = arith.subf %306, %311 : vector<16x32xf32>
    %313 = arith.mulf %312, %312 : vector<16x32xf32>
    %cst_82 = arith.constant dense<0.000000e+00> : vector<16xf32>
    %314 = vector.multi_reduction <add>, %313, %cst_82 [1] : vector<16x32xf32> to vector<16xf32>
    %315 = vector.shape_cast %314 : vector<16xf32> to vector<16x1xf32>
    %cst_83 = arith.constant 3.200000e+01 : f32
    %316 = vector.broadcast %cst_83 : f32 to vector<16x1xf32>
    %317 = arith.divf %315, %316 : vector<16x1xf32>
    %318 = vector.broadcast %310 : vector<16x1xf32> to vector<16x32xf32>
    %319 = arith.subf %306, %318 : vector<16x32xf32>
    %cst_84 = arith.constant 9.99999974E-6 : f32
    %320 = vector.broadcast %cst_84 : f32 to vector<16x1xf32>
    %321 = arith.addf %317, %320 : vector<16x1xf32>
    %322 = math.rsqrt %321 : vector<16x1xf32>
    %323 = vector.broadcast %322 : vector<16x1xf32> to vector<16x32xf32>
    %324 = arith.mulf %319, %323 : vector<16x32xf32>
    %325 = vector.broadcast %173 : vector<1x32xf32> to vector<16x32xf32>
    %326 = arith.mulf %324, %325 : vector<16x32xf32>
    %327 = vector.broadcast %174 : vector<1x32xf32> to vector<16x32xf32>
    %328 = arith.addf %326, %327 : vector<16x32xf32>
    %c2 = arith.constant 2 : index
    %c0_85 = arith.constant 0 : index
    %c0_86 = arith.constant 0 : index
    %329 = vector.load %arg3[%c2, %c0_85, %c0_86] : memref<3x96x32xbf16, #tpu.memory_space<vmem>>, vector<1x96x32xbf16>
    %330 = vector.shape_cast %329 : vector<1x96x32xbf16> to vector<96x32xbf16>
    %331 = vector.extract_strided_slice %330 {offsets = [0, 0], sizes = [32, 32], strides = [1, 1]} : vector<96x32xbf16> to vector<32x32xbf16>
    %c2_87 = arith.constant 2 : index
    %c0_88 = arith.constant 0 : index
    %c0_89 = arith.constant 0 : index
    %332 = vector.load %arg4[%c2_87, %c0_88, %c0_89] : memref<3x8x96xf32, #tpu.memory_space<vmem>>, vector<1x8x96xf32>
    %333 = vector.shape_cast %332 : vector<1x8x96xf32> to vector<8x96xf32>
    %334 = vector.extract_strided_slice %333 {offsets = [0, 0], sizes = [1, 32], strides = [1, 1]} : vector<8x96xf32> to vector<1x32xf32>
    %335 = arith.truncf %328 : vector<16x32xf32> to vector<16x32xbf16>
    %cst_90 = arith.constant dense<0.000000e+00> : vector<16x32xf32>
    %336 = tpu.matmul %335, %331, %cst_90 {dimension_numbers = #tpu.dot_dimension_numbers<[1], [0], [0], [1], [0, 0, 1, 1], [], []>} : vector<16x32xbf16>, vector<32x32xbf16>, vector<16x32xf32> -> vector<16x32xf32>
    %337 = vector.broadcast %334 : vector<1x32xf32> to vector<16x32xf32>
    %338 = arith.addf %336, %337 : vector<16x32xf32>
    %c0_91 = arith.constant 0 : index
    %c0_92 = arith.constant 0 : index
    %339 = vector.load %arg5[%c0_91, %c0_92] : memref<16x32xf32, #tpu.memory_space<vmem>>, vector<16x32xf32>
    tpu.vector_store %arg5[%c0_91, %c0_92], %338 {strides = array<i32>} : memref<16x32xf32, #tpu.memory_space<vmem>>, vector<16x32xf32>,
    return
  }
}

</mosaic_0001>

<bundles_post_ra>
// kernel: transformer_encoder.1
= control target key start
LH: loop header
LB: loop body
LE: loop exit
PB: predicated region body
PF: predicated region fallthrough
CT: control target
= control target key end

     0   :  { %v3301_v1 = vmov 0.0   ;;  %vm3302_vm0 = vmmov 0   ;;  %vm58_vm1 = vcmask 261120   ;;  %s3929_s0 = inlined_call_operand.vmem [shape: f32[16,32], index: 0, kind: input, shape index: {}]   ;;  %s3930_s1 = inlined_call_operand.vmem [shape: bf16[2,32,96], index: 1, kind: input, shape index: {}]   ;;  %s3931_s2 = inlined_call_operand.vmem [shape: bf16[2,32,64], index: 2, kind: input, shape index: {}]   ;;  %s3932_s3 = inlined_call_operand.vmem [shape: bf16[3,96,32], index: 3, kind: input, shape index: {}]   ;;  %s3933_s4 = inlined_call_operand.vmem [shape: f32[3,8,96], index: 4, kind: input, shape index: {}]   ;;  %s3934_s5 = inlined_call_operand.hbm [shape: f32[16,32], index: 5, kind: output, shape index: {}]  }
   0x1   :  { %v3175_v0 = vld [vmem:[%s3930_s1] sm:$0xff]   ;;  %2855 = vmatprep.subr.bf16.mxu0 %v3301_v1  ;;  %2863 = vmatprep.subr.bf16.mxu1 %v3301_v1  ;;  %v3176_v2 = vld [vmem:[%s3930_s1 + $0x8] sm:$0xff]  }
   0x2   :  { %2856 = vmatpush3.bf16.msra.mxu0 %v3175_v0  ;;  %2859 = vmatprep.mubr.msk.bf16.mxu0 %vm3302_vm0, %v3301_v1  ;;  %v3362_v3 = vld [vmem:[%s3929_s0] sm:$0xff]  ;;  %v3367_v4 = vld [vmem:[%s3929_s0 + $0x8] sm:$0xff] }
   0x3   :  { %2857 = vmatprep.subr.bf16.mxu0 %v3301_v1  ;;  %2865 = vmatprep.mubr.msk.bf16.mxu1 %vm3302_vm0, %v3301_v1  ;;  %v37_v5 = vpack.c.bf16 %v3367_v4, %v3362_v3 }
   0x6   :  { %2858 = vmatpush3.bf16.msra.mxu0 %v3176_v2 }
   0x7   :  { %2869 = vmatprep.subr.bf16.mxu0 %v3301_v1 }
   0x9   :  { %2860 = vmatmul.mubr.msk.bf16.vlgmr.msra.gmra.mrb[0].mxu0 %vm58_vm1, %v37_v5 }
   0xa   :  { %2871 = vmatprep.mubr.msk.bf16.mxu0 %vm3302_vm0, %v3301_v1 }
   0xb   :  { %10 = vsyncpa [#allocation3], 0  ;;  %v42_v6 = vlaneseq  ;;  %v3386_v9 = vld [vmem:[%s3933_s4] sm:$0xff]  ;;  %s3303_s27 = smov 96   ;;  %vm111_vm2 = vcmask 64512   ;;  %s3304_s28 = smov 64  }
   0xc   :  { %s3305_s29 = smov 88   ;;  %vm235_vm3 = vcmask 1043456   ;;  %s3306_s30 = smov 120   ;;  %vm1013_vm4 = vcmask 130048   ;;  %vm1016_vm5 = vcmask 195584   ;;  %vm1217_vm6 = vcmask 523264  }
   0xd   :  { %v3378_v7 = vshrl.u32 %v42_v6, 7  ;;  %s3307_s6 = smov 56   ;;  %s3308_s7 = smov 80  }
   0xe   :  { %s3309_s8 = smov 112   ;;  %s3310_s9 = smov 48  }
   0xf   :  { %v3381_v8 = vsub.s32 0, %v3378_v7  ;;  %s3311_s10 = smov 72   ;;  %s3312_s11 = smov 104  }
  0x10   :  { %s3313_s12 = smov 40   ;;  %s3314_s13 = smov 8  }
  0x11   :  { %v45_v10 = vrot.slane %v3386_v9, %v3381_v8  ;;  %s3315_s14 = smov 16   ;;  %s3316_s19 = smov 24  }
  0x12   :  { %s3317_s20 = smov [#allocation2]  }
  0x13   :  { %s2652_s21 = sshll.u32 %s3317_s20, 4  ;;  %s2653_s21 = int_to_ptr.vmem [resolvable:$true] %s2652_s21 }
  0x14   :  { %s3277_s22 = scalar_lea.vmem %s2653_s21, 256  ;;  %p3282_p1 = scmp.lt.s32.totalorder %s2653_s21, %s2653_s21 }
  0x15   :  { %p3278_p0 = scmp.ne.s32.totalorder %s2653_s21, %s3277_s22  ;;  %p3283_p2 = scmp.lt.s32.totalorder %s3277_s22, %s3277_s22 }
  0x17   :  { %p3284_p3 = por %p3283_p2, %p3282_p1 }
  0x19   :  { %p3285_p4 = pnand %p3284_p3, %p3278_p0 }
  0xdc   :  { %v96_v11 = vpop.f32.mrb[0].mxu0 }
  0xdd   :  { %v97_v12 = vadd.f32 %v96_v11, %v45_v10  ;;  %v2861_v13 = vpop.f32.mrb[1].mxu0 }
  0xde   :  { %v99_v14 = vpop.f32.mrb[2].mxu0 }
  0xdf   :  { %v3390_v15 = vpack.c.bf16 %v97_v12, %v97_v12  ;;  %v100_v16 = vadd.f32 %v99_v14, %v45_v10  ;;  %v2862_v17 = vpop.f32.mrb[3].mxu0 }
  0xe1   :  { %109 = vrot.lane.b32.xlu0 %v3390_v15, %s3303_s27  ;;  %v3394_v18 = vpack.c.bf16 %v100_v16, %v100_v16 }
  0xe5   :  { %158 = vrot.lane.b32.xlu0 %v3394_v18, %s3303_s27 }
 0x153   :  { %v110_v19 = vpop.permute.xlu0 %109 }
 0x154   :  { %v116_v20 = vsel %vm111_vm2, %v110_v19, 0 }
 0x155   :  { %2864 = vmatpush3.bf16.xpose.msra.mxu1 %v116_v20 }
 0x156   :  { %2875 = vmatprep.subr.bf16.mxu1 %v3301_v1 }
 0x157   :  { %v159_v21 = vpop.permute.xlu0 %158 }
 0x158   :  { %v164_v22 = vsel %vm111_vm2, %v159_v21, 0 }
 0x159   :  { %2870 = vmatpush3.bf16.xpose.msra.mxu0 %v164_v22 }
 0x15a   :  { %2881 = vmatprep.subr.bf16.mxu0 %v3301_v1 }
 0x15c   :  { %2866 = vmatmul.mubr.msk.bf16.vlgmr.msra.gmra.mrb[0].mxu1 %vm111_vm2, %v3390_v15 }
 0x15d   :  { %2877 = vmatprep.mubr.msk.bf16.mxu1 %vm3302_vm0, %v3301_v1 }
 0x160   :  { %2872 = vmatmul.mubr.msk.bf16.vlgmr.msra.gmra.mrb[4].mxu0 %vm111_vm2, %v3394_v18 }
 0x161   :  { %2883 = vmatprep.mubr.msk.bf16.mxu0 %vm3302_vm0, %v3301_v1 }
 0x22f   :  { %v152_v23 = vpop.f32.mrb[0].mxu1 }
 0x230   :  { %v2867_v24 = vpop.f32.mrb[1].mxu1  ;;  %v206_v25 = vsel %vm111_vm2, %v152_v23, -inf }
 0x231   :  { %207 = vmax.xlane.f32.xlu1 %v206_v25  ;;  %v155_v26 = vpop.f32.mrb[2].mxu1 }
 0x232   :  { %v2868_v27 = vpop.f32.mrb[3].mxu1 }
 0x233   :  { %v200_v28 = vpop.f32.mrb[4].mxu0 }
 0x234   :  { %v2873_v29 = vpop.f32.mrb[5].mxu0  ;;  %v209_v30 = vsel %vm111_vm2, %v200_v28, -inf }
 0x235   :  { %210 = vmax.xlane.f32.xlu1 %v209_v30  ;;  %v203_v31 = vpop.f32.mrb[6].mxu0 }
 0x236   :  { %v2874_v32 = vpop.f32.mrb[7].mxu0 }
 0x246   :  { %230 = vrot.lane.b32.xlu1 %v3390_v15, %s3304_s28 }
 0x24a   :  { %279 = vrot.lane.b32.xlu1 %v3394_v18, %s3304_s28 }
 0x24e   :  { %329 = vrot.lane.b32.xlu1 %v3390_v15, %s3305_s29 }
 0x2be   :  { %v208_v33 = vpop.xlane.xlu1 %207 }
 0x2bf   :  { %v212_v34 = vsub.f32 %v152_v23, %v208_v33 }
 0x2c1   :  { %v214_v35 = vmul.f32 1.442695, %v212_v34 }
 0x2c2   :  { %v211_v36 = vpop.xlane.xlu1 %210 }
 0x2c3   :  { %3197 = vpow2.f32 %v214_v35  ;;  %v213_v37 = vsub.f32 %v200_v28, %v211_v36 }
 0x2c5   :  { %v216_v38 = vmul.f32 1.442695, %v213_v37 }
 0x2c6   :  { %v231_v39 = vpop.permute.xlu1 %230 }
 0x2c7   :  { %3199 = vpow2.f32 %v216_v38  ;;  %v237_v40 = vsel %vm235_vm3, %v231_v39, 0 }
 0x2c8   :  { %2876 = vmatpush3.bf16.msra.mxu1 %v237_v40 }
 0x2c9   :  { %2887 = vmatprep.subr.bf16.mxu1 %v3301_v1 }
 0x2ca   :  { %v280_v41 = vpop.permute.xlu1 %279 }
 0x2cb   :  { %v285_v42 = vsel %vm235_vm3, %v280_v41, 0 }
 0x2cc   :  { %2882 = vmatpush3.bf16.msra.mxu0 %v285_v42 }
 0x2cd   :  { %v3198_v43 = vpop.eup %3197  ;;  %2893 = vmatprep.subr.bf16.mxu0 %v3301_v1 }
 0x2ce   :  { %v218_v44 = vsel %vm111_vm2, %v3198_v43, 0.0  ;;  %v330_v47 = vpop.permute.xlu1 %329 }
 0x2cf   :  { %219 = vadd.xlane.f32.xlu0 %v218_v44  ;;  %v335_v54 = vsel %vm111_vm2, %v330_v47, 0 }
 0x2d1   :  { %v3200_v45 = vpop.eup %3199 }
 0x2d2   :  { %v221_v46 = vsel %vm111_vm2, %v3200_v45, 0.0 }
 0x2d3   :  { %222 = vadd.xlane.f32.xlu1 %v221_v46 }
 0x2e4   :  { %379 = vrot.lane.b32.xlu1 %v3394_v18, %s3305_s29 }
 0x2e5   :  { %327 = vrot.lane.b32.xlu0 %v3390_v15, %s3306_s30 }
 0x2e8   :  { %377 = vrot.lane.b32.xlu1 %v3394_v18, %s3306_s30 }
 0x35c   :  { %v220_v48 = vpop.xlane.xlu0 %219 }
 0x35d   :  { %3201 = vrcp.f32 %v220_v48 }
 0x360   :  { %v223_v49 = vpop.xlane.xlu1 %222  ;;  %v328_v59 = vpop.permute.xlu0 %327 }
 0x361   :  { %3203 = vrcp.f32 %v223_v49 }
 0x364   :  { %v380_v56 = vpop.permute.xlu1 %379 }
 0x365   :  { %v385_v58 = vsel %vm111_vm2, %v380_v56, 0 }
 0x367   :  { %v3202_v50 = vpop.eup %3201 }
 0x368   :  { %v226_v51 = vmul.f32 %v3202_v50, %v3198_v43  ;;  %v378_v60 = vpop.permute.xlu1 %377 }
 0x36a   :  { %v228_v52 = vpack.c.bf16 %v226_v51, %v226_v51 }
 0x36b   :  { %v3204_v53 = vpop.eup %3203 }
 0x36c   :  { %v227_v55 = vmul.f32 %v3204_v53, %v3200_v45  ;;  %2878 = vmatmul.mubr.msk.bf16.vlgmr.msra.gmra.mrb[4].mxu1 %vm111_vm2, %v228_v52 }
 0x36d   :  { %2888 = vmatpush3.bf16.xpose.msra.mxu1 %v335_v54  ;;  %2889 = vmatprep.mubr.msk.bf16.mxu1 %vm3302_vm0, %v3301_v1 }
 0x36e   :  { %v229_v57 = vpack.c.bf16 %v227_v55, %v227_v55  ;;  %2899 = vmatprep.subr.bf16.mxu1 %v3301_v1 }
 0x370   :  { %2884 = vmatmul.mubr.msk.bf16.vlgmr.msra.gmra.mrb[8].mxu0 %vm111_vm2, %v229_v57 }
 0x371   :  { %2894 = vmatpush3.bf16.xpose.msra.mxu0 %v385_v58  ;;  %2895 = vmatprep.mubr.msk.bf16.mxu0 %vm3302_vm0, %v3301_v1 }
 0x372   :  { %2905 = vmatprep.subr.bf16.mxu0 %v3301_v1 }
 0x374   :  { %2890 = vmatmul.mubr.msk.bf16.vlgmr.msra.gmra.mrb[8].mxu1 %vm111_vm2, %v328_v59 }
 0x375   :  { %2901 = vmatprep.mubr.msk.bf16.mxu1 %vm3302_vm0, %v3301_v1 }
 0x378   :  { %2896 = vmatmul.mubr.msk.bf16.vlgmr.msra.gmra.mrb[12].mxu0 %vm111_vm2, %v378_v60 }
 0x379   :  { %2907 = vmatprep.mubr.msk.bf16.mxu0 %vm3302_vm0, %v3301_v1 }
 0x43f   :  { %v3446_v61 = vpop.f32.mrb[4].mxu1 }
 0x440   :  { %v2879_v62 = vpop.f32.mrb[5].mxu1 }
 0x441   :  { %v276_v63 = vpop.f32.mrb[6].mxu1 }
 0x442   :  { %v2880_v0 = vpop.f32.mrb[7].mxu1 }
 0x443   :  { %v3448_v2 = vpop.f32.mrb[8].mxu0 }
 0x444   :  { %v2885_v5 = vpop.f32.mrb[9].mxu0 }
 0x445   :  { %v324_v6 = vpop.f32.mrb[10].mxu0 }
 0x446   :  { %v2886_v10 = vpop.f32.mrb[11].mxu0 }
 0x447   :  { %v371_v11 = vpop.f32.mrb[8].mxu1 }
 0x448   :  { %v2891_v12 = vpop.f32.mrb[9].mxu1  ;;  %v427_v13 = vsel %vm111_vm2, %v371_v11, -inf }
 0x449   :  { %428 = vmax.xlane.f32.xlu1 %v427_v13  ;;  %v374_v14 = vpop.f32.mrb[10].mxu1 }
 0x44a   :  { %v2892_v16 = vpop.f32.mrb[11].mxu1 }
 0x44b   :  { %v421_v17 = vpop.f32.mrb[12].mxu0 }
 0x44c   :  { %v2897_v19 = vpop.f32.mrb[13].mxu0  ;;  %v430_v20 = vsel %vm111_vm2, %v421_v17, -inf }
 0x44d   :  { %431 = vmax.xlane.f32.xlu0 %v430_v20  ;;  %v424_v21 = vpop.f32.mrb[14].mxu0 }
 0x44e   :  { %v2898_v22 = vpop.f32.mrb[15].mxu0 }
 0x45a   :  { %451 = vrot.lane.b32.xlu1 %v3390_v15, %s3307_s6 }
 0x45e   :  { %549 = vrot.lane.b32.xlu1 %v3390_v15, %s3308_s7 }
 0x463   :  { %499 = vrot.lane.b32.xlu0 %v3394_v18, %s3307_s6 }
 0x467   :  { %547 = vrot.lane.b32.xlu0 %v3390_v15, %s3309_s8 }
 0x4d6   :  { %v429_v23 = vpop.xlane.xlu1 %428 }
 0x4d7   :  { %v433_v24 = vsub.f32 %v371_v11, %v429_v23 }
 0x4d9   :  { %v435_v25 = vmul.f32 1.442695, %v433_v24 }
 0x4da   :  { %v452_v26 = vpop.permute.xlu1 %451  ;;  %v432_v27 = vpop.xlane.xlu0 %431 }
 0x4db   :  { %3205 = vpow2.f32 %v435_v25  ;;  %v457_v28 = vsel %vm235_vm3, %v452_v26, 0  ;;  %v434_v29 = vsub.f32 %v421_v17, %v432_v27 }
 0x4dc   :  { %2900 = vmatpush3.bf16.msra.mxu1 %v457_v28 }
 0x4dd   :  { %v437_v30 = vmul.f32 1.442695, %v434_v29  ;;  %2911 = vmatprep.subr.bf16.mxu1 %v3301_v1 }
 0x4de   :  { %v500_v31 = vpop.permute.xlu0 %499  ;;  %v550_v37 = vpop.permute.xlu1 %549 }
 0x4df   :  { %3207 = vpow2.f32 %v437_v30  ;;  %v505_v32 = vsel %vm235_vm3, %v500_v31, 0  ;;  %v555_v44 = vsel %vm111_vm2, %v550_v37, 0 }
 0x4e0   :  { %2906 = vmatpush3.bf16.msra.mxu0 %v505_v32 }
 0x4e1   :  { %2917 = vmatprep.subr.bf16.mxu0 %v3301_v1 }
 0x4e2   :  { %v548_v49 = vpop.permute.xlu0 %547 }
 0x4e5   :  { %v3206_v33 = vpop.eup %3205 }
 0x4e6   :  { %v439_v34 = vsel %vm111_vm2, %v3206_v33, 0.0 }
 0x4e7   :  { %440 = vadd.xlane.f32.xlu1 %v439_v34 }
 0x4e9   :  { %v3208_v35 = vpop.eup %3207 }
 0x4ea   :  { %v442_v36 = vsel %vm111_vm2, %v3208_v35, 0.0 }
 0x4eb   :  { %443 = vadd.xlane.f32.xlu1 %v442_v36 }
 0x4fc   :  { %599 = vrot.lane.b32.xlu1 %v3394_v18, %s3308_s7 }
 0x500   :  { %597 = vrot.lane.b32.xlu1 %v3394_v18, %s3309_s8 }
 0x574   :  { %v441_v38 = vpop.xlane.xlu1 %440 }
 0x575   :  { %3209 = vrcp.f32 %v441_v38 }
 0x578   :  { %v444_v39 = vpop.xlane.xlu1 %443 }
 0x579   :  { %3211 = vrcp.f32 %v444_v39 }
 0x57c   :  { %v600_v46 = vpop.permute.xlu1 %599 }
 0x57d   :  { %v605_v48 = vsel %vm111_vm2, %v600_v46, 0 }
 0x57f   :  { %v3210_v40 = vpop.eup %3209 }
 0x580   :  { %v447_v41 = vmul.f32 %v3210_v40, %v3206_v33  ;;  %v598_v50 = vpop.permute.xlu1 %597 }
 0x582   :  { %v449_v42 = vpack.c.bf16 %v447_v41, %v447_v41 }
 0x583   :  { %v3212_v43 = vpop.eup %3211 }
 0x584   :  { %v448_v45 = vmul.f32 %v3212_v43, %v3208_v35  ;;  %2902 = vmatmul.mubr.msk.bf16.vlgmr.msra.gmra.mrb[12].mxu1 %vm111_vm2, %v449_v42 }
 0x585   :  { %2912 = vmatpush3.bf16.xpose.msra.mxu1 %v555_v44  ;;  %2913 = vmatprep.mubr.msk.bf16.mxu1 %vm3302_vm0, %v3301_v1 }
 0x586   :  { %v450_v47 = vpack.c.bf16 %v448_v45, %v448_v45  ;;  %2923 = vmatprep.subr.bf16.mxu1 %v3301_v1 }
 0x588   :  { %2908 = vmatmul.mubr.msk.bf16.vlgmr.msra.gmra.mrb[16].mxu0 %vm111_vm2, %v450_v47 }
 0x589   :  { %2918 = vmatpush3.bf16.xpose.msra.mxu0 %v605_v48  ;;  %2919 = vmatprep.mubr.msk.bf16.mxu0 %vm3302_vm0, %v3301_v1 }
 0x58a   :  { %2929 = vmatprep.subr.bf16.mxu0 %v3301_v1 }
 0x58c   :  { %2914 = vmatmul.mubr.msk.bf16.vlgmr.msra.gmra.mrb[16].mxu1 %vm111_vm2, %v548_v49 }
 0x58d   :  { %2925 = vmatprep.mubr.msk.bf16.mxu1 %vm3302_vm0, %v3301_v1 }
 0x590   :  { %2920 = vmatmul.mubr.msk.bf16.vlgmr.msra.gmra.mrb[20].mxu0 %vm111_vm2, %v598_v50 }
 0x591   :  { %2931 = vmatprep.mubr.msk.bf16.mxu0 %vm3302_vm0, %v3301_v1 }
 0x657   :  { %v3486_v51 = vpop.f32.mrb[12].mxu1 }
 0x658   :  { %v2903_v52 = vpop.f32.mrb[13].mxu1 }
 0x659   :  { %v496_v53 = vpop.f32.mrb[14].mxu1 }
 0x65a   :  { %v2904_v54 = vpop.f32.mrb[15].mxu1 }
 0x65b   :  { %v3488_v55 = vpop.f32.mrb[16].mxu0 }
 0x65c   :  { %v3145_v56 = vpack.i.bf16 %v3488_v55, %v3486_v51  ;;  %v2909_v57 = vpop.f32.mrb[17].mxu0 }
 0x65d   :  { %v544_v58 = vpop.f32.mrb[18].mxu0 }
 0x65e   :  { %v2910_v59 = vpop.f32.mrb[19].mxu0 }
 0x65f   :  { %v591_v60 = vpop.f32.mrb[16].mxu1 }
 0x660   :  { %v2915_v62 = vpop.f32.mrb[17].mxu1  ;;  %v647_v63 = vsel %vm111_vm2, %v591_v60, -inf }
 0x661   :  { %648 = vmax.xlane.f32.xlu0 %v647_v63  ;;  %v594_v0 = vpop.f32.mrb[18].mxu1 }
 0x662   :  { %v2916_v5 = vpop.f32.mrb[19].mxu1 }
 0x663   :  { %v641_v6 = vpop.f32.mrb[20].mxu0 }
 0x664   :  { %v2921_v10 = vpop.f32.mrb[21].mxu0  ;;  %v650_v11 = vsel %vm111_vm2, %v641_v6, -inf }
 0x665   :  { %651 = vmax.xlane.f32.xlu1 %v650_v11  ;;  %v644_v12 = vpop.f32.mrb[22].mxu0 }
 0x666   :  { %v2922_v13 = vpop.f32.mrb[23].mxu0 }
 0x676   :  { %671 = vrot.lane.b32.xlu1 %v3390_v15, %s3310_s9 }
 0x67a   :  { %769 = vrot.lane.b32.xlu1 %v3390_v15, %s3311_s10 }
 0x67e   :  { %819 = vrot.lane.b32.xlu1 %v3394_v18, %s3311_s10 }
 0x682   :  { %817 = vrot.lane.b32.xlu1 %v3394_v18, %s3312_s11 }
 0x6ee   :  { %v649_v14 = vpop.xlane.xlu0 %648 }
 0x6ef   :  { %v653_v16 = vsub.f32 %v591_v60, %v649_v14 }
 0x6f1   :  { %v655_v17 = vmul.f32 1.442695, %v653_v16 }
 0x6f2   :  { %v652_v19 = vpop.xlane.xlu1 %651 }
 0x6f3   :  { %3213 = vpow2.f32 %v655_v17  ;;  %v654_v20 = vsub.f32 %v641_v6, %v652_v19 }
 0x6f5   :  { %v657_v21 = vmul.f32 1.442695, %v654_v20 }
 0x6f6   :  { %v672_v22 = vpop.permute.xlu1 %671 }
 0x6f7   :  { %3215 = vpow2.f32 %v657_v21  ;;  %v677_v23 = vsel %vm235_vm3, %v672_v22, 0 }
 0x6f8   :  { %2924 = vmatpush3.bf16.msra.mxu1 %v677_v23 }
 0x6f9   :  { %2935 = vmatprep.subr.bf16.mxu1 %v3301_v1 }
 0x6fa   :  { %v770_v33 = vpop.permute.xlu1 %769 }
 0x6fb   :  { %v775_v37 = vsel %vm111_vm2, %v770_v33, 0 }
 0x6fd   :  { %v3214_v24 = vpop.eup %3213 }
 0x6fe   :  { %v659_v25 = vsel %vm111_vm2, %v3214_v24, 0.0  ;;  %v820_v39 = vpop.permute.xlu1 %819 }
 0x6ff   :  { %660 = vadd.xlane.f32.xlu0 %v659_v25  ;;  %v825_v41 = vsel %vm111_vm2, %v820_v39, 0 }
 0x701   :  { %v3216_v26 = vpop.eup %3215 }
 0x702   :  { %v662_v27 = vsel %vm111_vm2, %v3216_v26, 0.0  ;;  %v818_v43 = vpop.permute.xlu1 %817 }
 0x703   :  { %663 = vadd.xlane.f32.xlu0 %v662_v27 }
 0x719   :  { %719 = vrot.lane.b32.xlu0 %v3394_v18, %s3310_s9 }
 0x71d   :  { %767 = vrot.lane.b32.xlu0 %v3390_v15, %s3312_s11 }
 0x78c   :  { %v661_v28 = vpop.xlane.xlu0 %660 }
 0x78d   :  { %3217 = vrcp.f32 %v661_v28 }
 0x790   :  { %v664_v29 = vpop.xlane.xlu0 %663 }
 0x791   :  { %3219 = vrcp.f32 %v664_v29  ;;  %v3177_v29 = vld [vmem:[%s3932_s3] sm:$0xff]  }
 0x794   :  { %v720_v30 = vpop.permute.xlu0 %719 }
 0x795   :  { %v725_v31 = vsel %vm235_vm3, %v720_v30, 0  ;;  %v3178_v30 = vld [vmem:[%s3932_s3 + $0x8] sm:$0xff]  }
 0x796   :  { %2930 = vmatpush3.bf16.msra.mxu0 %v725_v31 }
 0x797   :  { %v3218_v32 = vpop.eup %3217  ;;  %2941 = vmatprep.subr.bf16.mxu0 %v3301_v1 }
 0x798   :  { %v667_v34 = vmul.f32 %v3218_v32, %v3214_v24  ;;  %v768_v42 = vpop.permute.xlu0 %767 }
 0x79a   :  { %v669_v35 = vpack.c.bf16 %v667_v34, %v667_v34 }
 0x79b   :  { %v3220_v36 = vpop.eup %3219 }
 0x79c   :  { %v668_v38 = vmul.f32 %v3220_v36, %v3216_v26  ;;  %2926 = vmatmul.mubr.msk.bf16.vlgmr.msra.gmra.mrb[20].mxu1 %vm111_vm2, %v669_v35 }
 0x79d   :  { %2936 = vmatpush3.bf16.xpose.msra.mxu1 %v775_v37  ;;  %2937 = vmatprep.mubr.msk.bf16.mxu1 %vm3302_vm0, %v3301_v1 }
 0x79e   :  { %v670_v40 = vpack.c.bf16 %v668_v38, %v668_v38  ;;  %2947 = vmatprep.subr.bf16.mxu1 %v3301_v1 }
 0x7a0   :  { %2932 = vmatmul.mubr.msk.bf16.vlgmr.msra.gmra.mrb[24].mxu0 %vm111_vm2, %v670_v40 }
 0x7a1   :  { %2942 = vmatpush3.bf16.xpose.msra.mxu0 %v825_v41  ;;  %2943 = vmatprep.mubr.msk.bf16.mxu0 %vm3302_vm0, %v3301_v1 }
 0x7a2   :  { %2953 = vmatprep.subr.bf16.mxu0 %v3301_v1 }
 0x7a4   :  { %2938 = vmatmul.mubr.msk.bf16.vlgmr.msra.gmra.mrb[24].mxu1 %vm111_vm2, %v768_v42 }
 0x7a5   :  { %2949 = vmatprep.mubr.msk.bf16.mxu1 %vm3302_vm0, %v3301_v1 }
 0x7a8   :  { %2944 = vmatmul.mubr.msk.bf16.vlgmr.msra.gmra.mrb[28].mxu0 %vm111_vm2, %v818_v43 }
 0x7a9   :  { %2955 = vmatprep.mubr.msk.bf16.mxu0 %vm3302_vm0, %v3301_v1 }
 0x86f   :  { %v713_v44 = vpop.f32.mrb[20].mxu1 }
 0x870   :  { %v2927_v45 = vpop.f32.mrb[21].mxu1 }
 0x871   :  { %v716_v46 = vpop.f32.mrb[22].mxu1 }
 0x872   :  { %v2928_v47 = vpop.f32.mrb[23].mxu1 }
 0x873   :  { %v761_v48 = vpop.f32.mrb[24].mxu0 }
 0x874   :  { %v3150_v49 = vpack.i.bf16 %v761_v48, %v713_v44  ;;  %v2933_v50 = vpop.f32.mrb[25].mxu0 }
 0x875   :  { %v764_v52 = vpop.f32.mrb[26].mxu0 }
 0x876   :  { %v2934_v53 = vpop.f32.mrb[27].mxu0 }
 0x877   :  { %v811_v54 = vpop.f32.mrb[24].mxu1 }
 0x878   :  { %v2939_v57 = vpop.f32.mrb[25].mxu1  ;;  %v867_v58 = vsel %vm111_vm2, %v811_v54, -inf }
 0x879   :  { %868 = vmax.xlane.f32.xlu0 %v867_v58  ;;  %v814_v59 = vpop.f32.mrb[26].mxu1 }
 0x87a   :  { %v2940_v60 = vpop.f32.mrb[27].mxu1 }
 0x87b   :  { %v861_v62 = vpop.f32.mrb[28].mxu0 }
 0x87c   :  { %v2945_v63 = vpop.f32.mrb[29].mxu0  ;;  %v870_v0 = vsel %vm111_vm2, %v861_v62, -inf }
 0x87d   :  { %871 = vmax.xlane.f32.xlu1 %v870_v0  ;;  %v864_v5 = vpop.f32.mrb[30].mxu0 }
 0x87e   :  { %v2946_v6 = vpop.f32.mrb[31].mxu0 }
 0x88e   :  { %891 = vrot.lane.b32.xlu1 %v3390_v15, %s3313_s12 }
 0x892   :  { %3146 = vrot.lane.b32.xlu1 %v3145_v56, %s3314_s13 }
 0x896   :  { %3151 = vrot.lane.b32.xlu1 %v3150_v49, %s3315_s14 }
 0x906   :  { %v869_v10 = vpop.xlane.xlu0 %868 }
 0x907   :  { %v873_v11 = vsub.f32 %v811_v54, %v869_v10 }
 0x909   :  { %v875_v12 = vmul.f32 1.442695, %v873_v11 }
 0x90a   :  { %v872_v13 = vpop.xlane.xlu1 %871 }
 0x90b   :  { %3221 = vpow2.f32 %v875_v12  ;;  %v874_v14 = vsub.f32 %v861_v62, %v872_v13 }
 0x90d   :  { %v877_v16 = vmul.f32 1.442695, %v874_v14 }
 0x90e   :  { %v892_v17 = vpop.permute.xlu1 %891 }
 0x90f   :  { %3223 = vpow2.f32 %v877_v16  ;;  %v897_v15 = vsel %vm235_vm3, %v892_v17, 0 }
 0x910   :  { %2948 = vmatpush3.bf16.msra.mxu1 %v897_v15 }
 0x911   :  { %2959 = vmatprep.subr.bf16.mxu1 %v3301_v1 }
 0x912   :  { %v3147_v40 = vpop.permute.xlu1 %3146 }
 0x913   :  { %v3149_v42 = vunpack.i.h.bf16 %v3147_v40  ;;  %v3148_v43 = vunpack.i.l.bf16 %v3147_v40 }
 0x915   :  { %v3222_v19 = vpop.eup %3221  ;;  %v1012_v47 = vsel %vm111_vm2, %v3448_v2, %v3149_v42  ;;  %v1011_v48 = vsel %vm111_vm2, %v3446_v61, %v3148_v43  ;;  %v1022_v2 = vsub.s32 2, %v3378_v7  ;;  %v3184_v42 = vld [vmem:[%s3932_s3 + $0x28] sm:$0xff]   ;;  %v1128_v43 = vsub.s32 1, %v3378_v7 }
 0x916   :  { %v879_v51 = vsel %vm111_vm2, %v3222_v19, 0.0  ;;  %v3152_v41 = vpop.permute.xlu1 %3151 }
 0x917   :  { %880 = vadd.xlane.f32.xlu0 %v879_v51  ;;  %v3154_v44 = vunpack.i.h.bf16 %v3152_v41  ;;  %v3153_v45 = vunpack.i.l.bf16 %v3152_v41  ;;  %v1023_v61 = vrot.slane %v3386_v9, %v1022_v2  ;;  %v3183_v41 = vld [vmem:[%s3932_s3 + $0x20] sm:$0xff]  }
 0x919   :  { %v3224_v55 = vpop.eup %3223  ;;  %v1014_v52 = vsel %vm1013_vm4, %v1011_v48, %v3153_v45  ;;  %v1015_v53 = vsel %vm1013_vm4, %v1012_v47, %v3154_v44  ;;  %v1129_v44 = vrot.slane %v3386_v9, %v1128_v43 }
 0x91a   :  { %v882_v56 = vsel %vm111_vm2, %v3224_v55, 0.0 }
 0x91b   :  { %883 = vadd.xlane.f32.xlu0 %v882_v56 }
 0x931   :  { %939 = vrot.lane.b32.xlu0 %v3394_v18, %s3313_s12 }
 0x9a4   :  { %v881_v20 = vpop.xlane.xlu0 %880 }
 0x9a5   :  { %3225 = vrcp.f32 %v881_v20  ;;  %v3180_v20 = vld [vmem:[%s3931_s2 + $0x8] sm:$0xff]  }
 0x9a8   :  { %v884_v21 = vpop.xlane.xlu0 %883 }
 0x9a9   :  { %3227 = vrcp.f32 %v884_v21  ;;  %v3181_v21 = vld [vmem:[%s3932_s3 + $0x10] sm:$0xff]  }
 0x9ac   :  { %v940_v22 = vpop.permute.xlu0 %939 }
 0x9ad   :  { %v945_v23 = vsel %vm235_vm3, %v940_v22, 0  ;;  %v3182_v22 = vld [vmem:[%s3932_s3 + $0x18] sm:$0xff]  }
 0x9ae   :  { %2954 = vmatpush3.bf16.msra.mxu0 %v945_v23 }
 0x9af   :  { %v3226_v24 = vpop.eup %3225  ;;  %2967 = vmatprep.subr.bf16.mxu0 %v3301_v1 }
 0x9b0   :  { %v887_v25 = vmul.f32 %v3226_v24, %v3222_v19 }
 0x9b2   :  { %v889_v26 = vpack.c.bf16 %v887_v25, %v887_v25 }
 0x9b3   :  { %v3228_v27 = vpop.eup %3227 }
 0x9b4   :  { %v888_v28 = vmul.f32 %v3228_v27, %v3224_v55  ;;  %2950 = vmatmul.mubr.msk.bf16.vlgmr.msra.gmra.mrb[28].mxu1 %vm111_vm2, %v889_v26 }
 0x9b5   :  { %2963 = vmatprep.mubr.msk.bf16.mxu1 %vm3302_vm0, %v3301_v1  ;;  %2960 = vmatpush3.bf16.msra.mxu1 %v3177_v29 }
 0x9b6   :  { %v890_v18 = vpack.c.bf16 %v888_v28, %v888_v28  ;;  %2961 = vmatprep.subr.bf16.mxu1 %v3301_v1 }
 0x9b8   :  { %2956 = vmatmul.mubr.msk.bf16.vlgmr.msra.gmra.mrb[32].mxu0 %vm111_vm2, %v890_v18  ;;  %v1111_v18 = vsub.s32 4, %v3378_v7 }
 0x9b9   :  { %2971 = vmatprep.mubr.msk.bf16.mxu0 %vm3302_vm0, %v3301_v1  ;;  %2962 = vmatpush3.bf16.msra.mxu1 %v3178_v30  ;;  %v1117_v30 = vsub.s32 5, %v3378_v7 }
 0x9ba   :  { %2975 = vmatprep.subr.bf16.mxu1 %v3301_v1  ;;  %v1112_v29 = vrot.slane %v3386_v9, %v1111_v18 }
 0xa87   :  { %v933_v31 = vpop.f32.mrb[28].mxu1 }
 0xa88   :  { %v2951_v32 = vpop.f32.mrb[29].mxu1 }
 0xa89   :  { %v936_v33 = vpop.f32.mrb[30].mxu1 }
 0xa8a   :  { %v2952_v34 = vpop.f32.mrb[31].mxu1 }
 0xa8b   :  { %v981_v35 = vpop.f32.mrb[32].mxu0 }
 0xa8c   :  { %v3155_v36 = vpack.i.bf16 %v981_v35, %v933_v31  ;;  %v2957_v37 = vpop.f32.mrb[33].mxu0 }
 0xa8d   :  { %v984_v38 = vpop.f32.mrb[34].mxu0 }
 0xa8e   :  { %3156 = vrot.lane.b32.xlu0 %v3155_v36, %s3316_s19  ;;  %v2958_v39 = vpop.f32.mrb[35].mxu0  ;;  %v1118_v36 = vrot.slane %v3386_v9, %v1117_v30 }
 0xb00   :  { %v3157_v46 = vpop.permute.xlu0 %3156 }
 0xb01   :  { %v3159_v49 = vunpack.i.h.bf16 %v3157_v46  ;;  %v3158_v50 = vunpack.i.l.bf16 %v3157_v46 }
 0xb03   :  { %v1018_v54 = vsel %vm1016_vm5, %v1015_v53, %v3159_v49  ;;  %v1017_v57 = vsel %vm1016_vm5, %v1014_v52, %v3158_v50 }
 0xb04   :  { %v1019_v58 = vpack.c.bf16 %v1018_v54, %v1017_v57  ;;  %v1191_v57 = vsub.s32 3, %v3378_v7 }
 0xb06   :  { %2964 = vmatmul.mubr.msk.bf16.vlgmr.msra.gmra.mrb[32].mxu1 %vm58_vm1, %v1019_v58  ;;  %v1192_v58 = vrot.slane %v3386_v9, %v1191_v57 }
 0xb07   :  { %2983 = vmatprep.mubr.msk.bf16.mxu1 %vm3302_vm0, %v3301_v1  ;;  %2976 = vmatpush3.bf16.msra.mxu1 %v3181_v21 }
 0xb08   :  { %2977 = vmatprep.subr.bf16.mxu1 %v3301_v1 }
 0xb0b   :  { %2978 = vmatpush3.bf16.msra.mxu1 %v3182_v22 }
 0xb0c   :  { %2979 = vmatprep.subr.bf16.mxu1 %v3301_v1 }
 0xb0f   :  { %2980 = vmatpush3.bf16.msra.mxu1 %v3183_v41 }
 0xb10   :  { %2981 = vmatprep.subr.bf16.mxu1 %v3301_v1 }
 0xb13   :  { %2982 = vmatpush3.bf16.msra.mxu1 %v3184_v42 }
 0xb14   :  { %3001 = vmatprep.subr.bf16.mxu1 %v3301_v1 }
 0xbd9   :  { %v1073_v59 = vpop.f32.mrb[32].mxu1 }
 0xbda   :  { %v1074_v60 = vadd.f32 %v1073_v59, %v1023_v61  ;;  %v2965_v62 = vpop.f32.mrb[33].mxu1 }
 0xbdb   :  { %v1076_v63 = vpop.f32.mrb[34].mxu1 }
 0xbdc   :  { %v1077_v0 = vadd.f32 %v1076_v63, %v1023_v61  ;;  %v2966_v5 = vpop.f32.mrb[35].mxu1  ;;  %v1080_v6 = vadd.f32 %v1074_v60, %v3362_v3 }
 0xbde   :  { %v1082_v10 = vsel %vm58_vm1, %v1080_v6, 0.0  ;;  %v1081_v11 = vadd.f32 %v1077_v0, %v3367_v4  ;;  %v3179_v4 = vld [vmem:[%s3931_s2] sm:$0xff]  }
 0xbdf   :  { %1083 = vadd.xlane.f32.xlu1 %v1082_v10  ;;  %2968 = vmatpush3.bf16.msra.mxu0 %v3179_v4  ;;  %v3186_v4 = vld [vmem:[%s3930_s1 + $0x18] sm:$0xff]  }
 0xbe0   :  { %v1085_v12 = vsel %vm58_vm1, %v1081_v11, 0.0  ;;  %2969 = vmatprep.subr.bf16.mxu0 %v3301_v1 }
 0xbe1   :  { %1086 = vadd.xlane.f32.xlu0 %v1085_v12 }
 0xbe3   :  { %2970 = vmatpush3.bf16.msra.mxu0 %v3180_v20 }
 0xbe4   :  { %2987 = vmatprep.subr.bf16.mxu0 %v3301_v1 }
 0xc6c   :  { %v1084_v13 = vpop.xlane.xlu1 %1083 }
 0xc6d   :  { %v1089_v14 = vmul.f32 0.03125, %v1084_v13 }
 0xc6e   :  { %v1087_v16 = vpop.xlane.xlu0 %1086 }
 0xc6f   :  { %v1091_v17 = vsub.f32 %v1080_v6, %v1089_v14  ;;  %v1090_v15 = vmul.f32 0.03125, %v1087_v16 }
 0xc71   :  { %v1092_v19 = vsub.f32 %v1081_v11, %v1090_v15  ;;  %v1093_v51 = vmul.f32 %v1091_v17, %v1091_v17 }
 0xc73   :  { %v1095_v55 = vsel %vm58_vm1, %v1093_v51, 0.0  ;;  %v1094_v56 = vmul.f32 %v1092_v19, %v1092_v19 }
 0xc74   :  { %1096 = vadd.xlane.f32.xlu0 %v1095_v55 }
 0xc75   :  { %v1098_v3 = vsel %vm58_vm1, %v1094_v56, 0.0 }
 0xc76   :  { %1099 = vadd.xlane.f32.xlu1 %v1098_v3  ;;  %v3185_v3 = vld [vmem:[%s3930_s1 + $0x10] sm:$0xff]  }
 0xd01   :  { %v1097_v23 = vpop.xlane.xlu0 %1096 }
 0xd02   :  { %v1101_v24 = vmul.f32 0.03125, %v1097_v23 }
 0xd03   :  { %v1100_v25 = vpop.xlane.xlu1 %1099 }
 0xd04   :  { %v1103_v26 = vadd.f32 1e-05, %v1101_v24  ;;  %v1102_v27 = vmul.f32 0.03125, %v1100_v25 }
 0xd06   :  { %3229 = vrsqrt.f32 %v1103_v26  ;;  %v1104_v28 = vadd.f32 1e-05, %v1102_v27  ;;  %v1292_v26 = vsub.s32 6, %v3378_v7 }
 0xd08   :  { %3231 = vrsqrt.f32 %v1104_v28  ;;  %v1293_v27 = vrot.slane %v3386_v9, %v1292_v26  ;;  %v1298_v28 = vsub.s32 7, %v3378_v7 }
 0xd10   :  { %v3230_v31 = vpop.eup %3229 }
 0xd11   :  { %v1107_v32 = vmul.f32 %v3230_v31, %v1091_v17 }
 0xd12   :  { %v3232_v33 = vpop.eup %3231 }
 0xd13   :  { %v1113_v34 = vmul.f32 %v1112_v29, %v1107_v32  ;;  %v1108_v35 = vmul.f32 %v3232_v33, %v1092_v19 }
 0xd15   :  { %v1114_v37 = vmul.f32 %v1112_v29, %v1108_v35  ;;  %v1119_v38 = vadd.f32 %v1118_v36, %v1113_v34  ;;  %v1299_v35 = vrot.slane %v3386_v9, %v1298_v28 }
 0xd17   :  { %v1120_v39 = vadd.f32 %v1118_v36, %v1114_v37 }
 0xd19   :  { %v1121_v40 = vpack.c.bf16 %v1120_v39, %v1119_v38 }
 0xd1b   :  { %2972 = vmatmul.mubr.msk.bf16.vlgmr.msra.gmra.mrb[36].mxu0 %vm58_vm1, %v1121_v40  ;;  %v3659_v40 = vld [vmem:[%s3933_s4 + $0x8] sm:$0xff] }
 0xd1c   :  { %2991 = vmatprep.mubr.msk.bf16.mxu0 %vm3302_vm0, %v3301_v1  ;;  %2988 = vmatpush3.bf16.msra.mxu0 %v3185_v3  ;;  %v1326_v9 = vrot.slane %v3659_v40, %v3381_v8 }
 0xd1d   :  { %2989 = vmatprep.subr.bf16.mxu0 %v3301_v1 }
 0xd20   :  { %2990 = vmatpush3.bf16.msra.mxu0 %v3186_v4 }
 0xd21   :  { %2995 = vmatprep.subr.bf16.mxu0 %v3301_v1 }
 0xdee   :  { %v1179_v45 = vpop.f32.mrb[36].mxu0 }
 0xdef   :  { %v1180_v46 = vadd.f32 %v1179_v45, %v1129_v44  ;;  %v2973_v47 = vpop.f32.mrb[37].mxu0 }
 0xdf0   :  { %v1182_v48 = vpop.f32.mrb[38].mxu0 }
 0xdf1   :  { %v1183_v49 = vadd.f32 %v1182_v48, %v1129_v44  ;;  %v2974_v50 = vpop.f32.mrb[39].mxu0  ;;  %v1186_v52 = vmax.f32 %v1180_v46, 0.0 }
 0xdf3   :  { %v1187_v53 = vmax.f32 %v1183_v49, 0.0 }
 0xdf5   :  { %v1188_v54 = vpack.c.bf16 %v1187_v53, %v1186_v52 }
 0xdf7   :  { %2984 = vmatmul.mubr.msk.bf16.vlgmr.msra.gmra.mrb[36].mxu1 %vm1217_vm6, %v1188_v54 }
 0xdf8   :  { %3003 = vmatprep.mubr.msk.bf16.mxu1 %vm3302_vm0, %v3301_v1 }
 0xeca   :  { %v1255_v61 = vpop.f32.mrb[36].mxu1 }
 0xecb   :  { %v1256_v59 = vadd.f32 %v1255_v61, %v1192_v58  ;;  %v2985_v60 = vpop.f32.mrb[37].mxu1 }
 0xecc   :  { %v1258_v62 = vpop.f32.mrb[38].mxu1 }
 0xecd   :  { %v1259_v63 = vadd.f32 %v1258_v62, %v1192_v58  ;;  %v2986_v0 = vpop.f32.mrb[39].mxu1  ;;  %v1262_v5 = vadd.f32 %v1256_v59, %v1119_v38 }
 0xecf   :  { %v1264_v6 = vsel %vm58_vm1, %v1262_v5, 0.0  ;;  %v1263_v10 = vadd.f32 %v1259_v63, %v1120_v39 }
 0xed0   :  { %1265 = vadd.xlane.f32.xlu0 %v1264_v6 }
 0xed1   :  { %v1267_v11 = vsel %vm58_vm1, %v1263_v10, 0.0 }
 0xed2   :  { %1268 = vadd.xlane.f32.xlu1 %v1267_v11 }
 0xf5d   :  { %v1266_v12 = vpop.xlane.xlu0 %1265 }
 0xf5e   :  { %v1270_v13 = vmul.f32 0.03125, %v1266_v12 }
 0xf5f   :  { %v1269_v14 = vpop.xlane.xlu1 %1268 }
 0xf60   :  { %v1272_v16 = vsub.f32 %v1262_v5, %v1270_v13  ;;  %v1271_v17 = vmul.f32 0.03125, %v1269_v14 }
 0xf62   :  { %v1273_v15 = vsub.f32 %v1263_v10, %v1271_v17  ;;  %v1274_v19 = vmul.f32 %v1272_v16, %v1272_v16 }
 0xf64   :  { %v1276_v51 = vsel %vm58_vm1, %v1274_v19, 0.0  ;;  %v1275_v55 = vmul.f32 %v1273_v15, %v1273_v15 }
 0xf65   :  { %1277 = vadd.xlane.f32.xlu0 %v1276_v51 }
 0xf66   :  { %v1279_v56 = vsel %vm58_vm1, %v1275_v55, 0.0 }
 0xf67   :  { %1280 = vadd.xlane.f32.xlu1 %v1279_v56 }
 0xff2   :  { %v1278_v20 = vpop.xlane.xlu0 %1277 }
 0xff3   :  { %v1282_v21 = vmul.f32 0.03125, %v1278_v20 }
 0xff4   :  { %v1281_v22 = vpop.xlane.xlu1 %1280 }
 0xff5   :  { %v1284_v23 = vadd.f32 1e-05, %v1282_v21  ;;  %v1283_v24 = vmul.f32 0.03125, %v1281_v22 }
 0xff7   :  { %3233 = vrsqrt.f32 %v1284_v23  ;;  %v1285_v25 = vadd.f32 1e-05, %v1283_v24 }
 0xff9   :  { %3235 = vrsqrt.f32 %v1285_v25 }
0x1001   :  { %v3234_v29 = vpop.eup %3233 }
0x1002   :  { %v1288_v31 = vmul.f32 %v3234_v29, %v1272_v16 }
0x1003   :  { %v3236_v32 = vpop.eup %3235 }
0x1004   :  { %v1294_v33 = vmul.f32 %v1293_v27, %v1288_v31  ;;  %v1289_v34 = vmul.f32 %v3236_v32, %v1273_v15 }
0x1006   :  { %v1295_v36 = vmul.f32 %v1293_v27, %v1289_v34  ;;  %v3647_v37 = vadd.f32 %v1299_v35, %v1294_v33 }
0x1008   :  { %v3649_v38 = vadd.f32 %v1299_v35, %v1295_v36 }
0x100a   :  { %v1317_v39 = vpack.c.bf16 %v3649_v38, %v3647_v37 }
0x100c   :  { %2992 = vmatmul.mubr.msk.bf16.vlgmr.msra.gmra.mrb[40].mxu0 %vm58_vm1, %v1317_v39 }
0x100d   :  { %2997 = vmatprep.mubr.msk.bf16.mxu0 %vm3302_vm0, %v3301_v1 }
0x10df   :  { %v1376_v41 = vpop.f32.mrb[40].mxu0 }
0x10e0   :  { %v1377_v42 = vadd.f32 %v1376_v41, %v1326_v9  ;;  %v2993_v44 = vpop.f32.mrb[41].mxu0 }
0x10e1   :  { %v1379_v45 = vpop.f32.mrb[42].mxu0 }
0x10e2   :  { %v3663_v46 = vpack.c.bf16 %v1377_v42, %v1377_v42  ;;  %v1380_v47 = vadd.f32 %v1379_v45, %v1326_v9  ;;  %v2994_v48 = vpop.f32.mrb[43].mxu0 }
0x10e4   :  { %v3665_v49 = vpack.c.bf16 %v1380_v47, %v1380_v47  ;;  %1389 = vrot.lane.b32.xlu0 %v3663_v46, %s3303_s27 }
0x10e6   :  { %1437 = vrot.lane.b32.xlu1 %v3665_v49, %s3303_s27 }
0x1156   :  { %v1390_v50 = vpop.permute.xlu0 %1389 }
0x1157   :  { %v1395_v52 = vsel %vm111_vm2, %v1390_v50, 0 }
0x1158   :  { %2996 = vmatpush3.bf16.xpose.msra.mxu0 %v1395_v52  ;;  %v1438_v53 = vpop.permute.xlu1 %1437 }
0x1159   :  { %v1443_v54 = vsel %vm111_vm2, %v1438_v53, 0  ;;  %3007 = vmatprep.subr.bf16.mxu0 %v3301_v1 }
0x115a   :  { %3002 = vmatpush3.bf16.xpose.msra.mxu1 %v1443_v54 }
0x115b   :  { %3013 = vmatprep.subr.bf16.mxu1 %v3301_v1 }
0x115f   :  { %2998 = vmatmul.mubr.msk.bf16.vlgmr.msra.gmra.mrb[44].mxu0 %vm111_vm2, %v3663_v46 }
0x1160   :  { %3009 = vmatprep.mubr.msk.bf16.mxu0 %vm3302_vm0, %v3301_v1 }
0x1161   :  { %3004 = vmatmul.mubr.msk.bf16.vlgmr.msra.gmra.mrb[40].mxu1 %vm111_vm2, %v3665_v49 }
0x1162   :  { %3015 = vmatprep.mubr.msk.bf16.mxu1 %vm3302_vm0, %v3301_v1 }
0x1232   :  { %v1431_v58 = vpop.f32.mrb[44].mxu0 }
0x1233   :  { %v2999_v61 = vpop.f32.mrb[45].mxu0  ;;  %v1485_v59 = vsel %vm111_vm2, %v1431_v58, -inf }
0x1234   :  { %v1479_v60 = vpop.f32.mrb[40].mxu1  ;;  %1486 = vmax.xlane.f32.xlu1 %v1485_v59  ;;  %v1434_v62 = vpop.f32.mrb[46].mxu0 }
0x1235   :  { %v3000_v63 = vpop.f32.mrb[47].mxu0  ;;  %v3005_v0 = vpop.f32.mrb[41].mxu1  ;;  %v1488_v5 = vsel %vm111_vm2, %v1479_v60, -inf }
0x1236   :  { %1489 = vmax.xlane.f32.xlu0 %v1488_v5  ;;  %v1482_v6 = vpop.f32.mrb[42].mxu1 }
0x1237   :  { %v3006_v10 = vpop.f32.mrb[43].mxu1 }
0x1245   :  { %1557 = vrot.lane.b32.xlu1 %v3665_v49, %s3304_s28 }
0x124c   :  { %1509 = vrot.lane.b32.xlu0 %v3663_v46, %s3304_s28 }
0x12c1   :  { %v1487_v11 = vpop.xlane.xlu1 %1486 }
0x12c2   :  { %v1491_v12 = vsub.f32 %v1431_v58, %v1487_v11 }
0x12c3   :  { %v1490_v13 = vpop.xlane.xlu0 %1489 }
0x12c4   :  { %v1493_v14 = vmul.f32 1.442695, %v1491_v12  ;;  %v1492_v16 = vsub.f32 %v1479_v60, %v1490_v13 }
0x12c5   :  { %v1558_v17 = vpop.permute.xlu1 %1557 }
0x12c6   :  { %3237 = vpow2.f32 %v1493_v14  ;;  %v1495_v15 = vmul.f32 1.442695, %v1492_v16  ;;  %v1563_v19 = vsel %vm235_vm3, %v1558_v17, 0 }
0x12c7   :  { %v1510_v51 = vpop.permute.xlu0 %1509  ;;  %3014 = vmatpush3.bf16.msra.mxu1 %v1563_v19 }
0x12c8   :  { %3239 = vpow2.f32 %v1495_v15  ;;  %v1515_v55 = vsel %vm235_vm3, %v1510_v51, 0  ;;  %3025 = vmatprep.subr.bf16.mxu1 %v3301_v1 }
0x12c9   :  { %3008 = vmatpush3.bf16.msra.mxu0 %v1515_v55 }
0x12ca   :  { %3019 = vmatprep.subr.bf16.mxu0 %v3301_v1 }
0x12d0   :  { %v3238_v56 = vpop.eup %3237 }
0x12d1   :  { %v1497_v3 = vsel %vm111_vm2, %v3238_v56, 0.0 }
0x12d2   :  { %v3240_v4 = vpop.eup %3239  ;;  %1498 = vadd.xlane.f32.xlu0 %v1497_v3 }
0x12d3   :  { %v1500_v20 = vsel %vm111_vm2, %v3240_v4, 0.0 }
0x12d4   :  { %1501 = vadd.xlane.f32.xlu1 %v1500_v20 }
0x12e5   :  { %1607 = vrot.lane.b32.xlu1 %v3663_v46, %s3305_s29 }
0x12e8   :  { %1657 = vrot.lane.b32.xlu0 %v3665_v49, %s3305_s29 }
0x12e9   :  { %1605 = vrot.lane.b32.xlu1 %v3663_v46, %s3306_s30 }
0x12ec   :  { %1655 = vrot.lane.b32.xlu0 %v3665_v49, %s3306_s30 }
0x135f   :  { %v1499_v21 = vpop.xlane.xlu0 %1498 }
0x1360   :  { %3241 = vrcp.f32 %v1499_v21 }
0x1361   :  { %v1502_v22 = vpop.xlane.xlu1 %1501 }
0x1362   :  { %3243 = vrcp.f32 %v1502_v22 }
0x1363   :  { %v1658_v32 = vpop.permute.xlu0 %1657 }
0x1364   :  { %v1663_v35 = vsel %vm111_vm2, %v1658_v32, 0 }
0x1365   :  { %v1608_v27 = vpop.permute.xlu1 %1607 }
0x1366   :  { %v1613_v33 = vsel %vm111_vm2, %v1608_v27, 0 }
0x1367   :  { %v1656_v39 = vpop.permute.xlu0 %1655 }
0x1369   :  { %v1606_v36 = vpop.permute.xlu1 %1605 }
0x136a   :  { %v3242_v23 = vpop.eup %3241 }
0x136b   :  { %v1505_v24 = vmul.f32 %v3242_v23, %v3238_v56 }
0x136c   :  { %v3244_v25 = vpop.eup %3243 }
0x136d   :  { %v1506_v29 = vmul.f32 %v3244_v25, %v3240_v4  ;;  %v1507_v31 = vpack.c.bf16 %v1505_v24, %v1505_v24 }
0x136f   :  { %3010 = vmatmul.mubr.msk.bf16.vlgmr.msra.gmra.mrb[48].mxu0 %vm111_vm2, %v1507_v31  ;;  %v1508_v34 = vpack.c.bf16 %v1506_v29, %v1506_v29 }
0x1370   :  { %3020 = vmatpush3.bf16.xpose.msra.mxu0 %v1613_v33  ;;  %3021 = vmatprep.mubr.msk.bf16.mxu0 %vm3302_vm0, %v3301_v1 }
0x1371   :  { %3016 = vmatmul.mubr.msk.bf16.vlgmr.msra.gmra.mrb[44].mxu1 %vm111_vm2, %v1508_v34  ;;  %3031 = vmatprep.subr.bf16.mxu0 %v3301_v1 }
0x1372   :  { %3026 = vmatpush3.bf16.xpose.msra.mxu1 %v1663_v35  ;;  %3027 = vmatprep.mubr.msk.bf16.mxu1 %vm3302_vm0, %v3301_v1 }
0x1373   :  { %3037 = vmatprep.subr.bf16.mxu1 %v3301_v1 }
0x1377   :  { %3022 = vmatmul.mubr.msk.bf16.vlgmr.msra.gmra.mrb[52].mxu0 %vm111_vm2, %v1606_v36 }
0x1378   :  { %3033 = vmatprep.mubr.msk.bf16.mxu0 %vm3302_vm0, %v3301_v1 }
0x1379   :  { %3028 = vmatmul.mubr.msk.bf16.vlgmr.msra.gmra.mrb[48].mxu1 %vm111_vm2, %v1656_v39 }
0x137a   :  { %3039 = vmatprep.mubr.msk.bf16.mxu1 %vm3302_vm0, %v3301_v1 }
0x1442   :  { %v3719_v9 = vpop.f32.mrb[48].mxu0 }
0x1443   :  { %v3011_v41 = vpop.f32.mrb[49].mxu0 }
0x1444   :  { %v1554_v42 = vpop.f32.mrb[50].mxu0  ;;  %v3721_v44 = vpop.f32.mrb[44].mxu1 }
0x1445   :  { %v3012_v45 = vpop.f32.mrb[51].mxu0  ;;  %v3017_v47 = vpop.f32.mrb[45].mxu1 }
0x1446   :  { %v1602_v48 = vpop.f32.mrb[46].mxu1 }
0x1447   :  { %v3018_v50 = vpop.f32.mrb[47].mxu1 }
0x144a   :  { %v1649_v52 = vpop.f32.mrb[52].mxu0 }
0x144b   :  { %v3023_v53 = vpop.f32.mrb[53].mxu0  ;;  %v1705_v54 = vsel %vm111_vm2, %v1649_v52, -inf }
0x144c   :  { %v1699_v58 = vpop.f32.mrb[48].mxu1  ;;  %1706 = vmax.xlane.f32.xlu1 %v1705_v54  ;;  %v1652_v61 = vpop.f32.mrb[54].mxu0 }
0x144d   :  { %v3024_v59 = vpop.f32.mrb[55].mxu0  ;;  %v3029_v60 = vpop.f32.mrb[49].mxu1  ;;  %v1708_v62 = vsel %vm111_vm2, %v1699_v58, -inf }
0x144e   :  { %1709 = vmax.xlane.f32.xlu0 %v1708_v62  ;;  %v1702_v63 = vpop.f32.mrb[50].mxu1 }
0x144f   :  { %v3030_v0 = vpop.f32.mrb[51].mxu1 }
0x145d   :  { %1777 = vrot.lane.b32.xlu1 %v3665_v49, %s3307_s6 }
0x1464   :  { %1729 = vrot.lane.b32.xlu0 %v3663_v46, %s3307_s6 }
0x14d9   :  { %v1707_v5 = vpop.xlane.xlu1 %1706 }
0x14da   :  { %v1711_v6 = vsub.f32 %v1649_v52, %v1707_v5 }
0x14db   :  { %v1710_v10 = vpop.xlane.xlu0 %1709 }
0x14dc   :  { %v1713_v11 = vmul.f32 1.442695, %v1711_v6  ;;  %v1712_v12 = vsub.f32 %v1699_v58, %v1710_v10 }
0x14dd   :  { %v1778_v13 = vpop.permute.xlu1 %1777 }
0x14de   :  { %3245 = vpow2.f32 %v1713_v11  ;;  %v1715_v14 = vmul.f32 1.442695, %v1712_v12  ;;  %v1783_v16 = vsel %vm235_vm3, %v1778_v13, 0 }
0x14df   :  { %v1730_v17 = vpop.permute.xlu0 %1729  ;;  %3038 = vmatpush3.bf16.msra.mxu1 %v1783_v16 }
0x14e0   :  { %3247 = vpow2.f32 %v1715_v14  ;;  %v1735_v15 = vsel %vm235_vm3, %v1730_v17, 0  ;;  %3049 = vmatprep.subr.bf16.mxu1 %v3301_v1 }
0x14e1   :  { %3032 = vmatpush3.bf16.msra.mxu0 %v1735_v15 }
0x14e2   :  { %3043 = vmatprep.subr.bf16.mxu0 %v3301_v1 }
0x14e8   :  { %v3246_v19 = vpop.eup %3245 }
0x14e9   :  { %v1717_v51 = vsel %vm111_vm2, %v3246_v19, 0.0 }
0x14ea   :  { %v3248_v55 = vpop.eup %3247  ;;  %1718 = vadd.xlane.f32.xlu0 %v1717_v51 }
0x14eb   :  { %v1720_v56 = vsel %vm111_vm2, %v3248_v55, 0.0 }
0x14ec   :  { %1721 = vadd.xlane.f32.xlu1 %v1720_v56 }
0x14fd   :  { %1827 = vrot.lane.b32.xlu1 %v3663_v46, %s3308_s7 }
0x1500   :  { %1877 = vrot.lane.b32.xlu0 %v3665_v49, %s3308_s7 }
0x1501   :  { %1825 = vrot.lane.b32.xlu1 %v3663_v46, %s3309_s8 }
0x1504   :  { %1875 = vrot.lane.b32.xlu0 %v3665_v49, %s3309_s8 }
0x1577   :  { %v1719_v3 = vpop.xlane.xlu0 %1718 }
0x1578   :  { %3249 = vrcp.f32 %v1719_v3 }
0x1579   :  { %v1722_v4 = vpop.xlane.xlu1 %1721 }
0x157a   :  { %3251 = vrcp.f32 %v1722_v4 }
0x157b   :  { %v1878_v27 = vpop.permute.xlu0 %1877 }
0x157c   :  { %v1883_v32 = vsel %vm111_vm2, %v1878_v27, 0 }
0x157d   :  { %v1828_v23 = vpop.permute.xlu1 %1827 }
0x157e   :  { %v1833_v29 = vsel %vm111_vm2, %v1828_v23, 0 }
0x157f   :  { %v1876_v34 = vpop.permute.xlu0 %1875 }
0x1581   :  { %v1826_v33 = vpop.permute.xlu1 %1825 }
0x1582   :  { %v3250_v20 = vpop.eup %3249 }
0x1583   :  { %v1725_v21 = vmul.f32 %v3250_v20, %v3246_v19 }
0x1584   :  { %v3252_v22 = vpop.eup %3251 }
0x1585   :  { %v1726_v24 = vmul.f32 %v3252_v22, %v3248_v55  ;;  %v1727_v25 = vpack.c.bf16 %v1725_v21, %v1725_v21 }
0x1587   :  { %3034 = vmatmul.mubr.msk.bf16.vlgmr.msra.gmra.mrb[56].mxu0 %vm111_vm2, %v1727_v25  ;;  %v1728_v31 = vpack.c.bf16 %v1726_v24, %v1726_v24 }
0x1588   :  { %3044 = vmatpush3.bf16.xpose.msra.mxu0 %v1833_v29  ;;  %3045 = vmatprep.mubr.msk.bf16.mxu0 %vm3302_vm0, %v3301_v1 }
0x1589   :  { %3040 = vmatmul.mubr.msk.bf16.vlgmr.msra.gmra.mrb[52].mxu1 %vm111_vm2, %v1728_v31  ;;  %3055 = vmatprep.subr.bf16.mxu0 %v3301_v1 }
0x158a   :  { %3050 = vmatpush3.bf16.xpose.msra.mxu1 %v1883_v32  ;;  %3051 = vmatprep.mubr.msk.bf16.mxu1 %vm3302_vm0, %v3301_v1 }
0x158b   :  { %3061 = vmatprep.subr.bf16.mxu1 %v3301_v1 }
0x158f   :  { %3046 = vmatmul.mubr.msk.bf16.vlgmr.msra.gmra.mrb[60].mxu0 %vm111_vm2, %v1826_v33 }
0x1590   :  { %3057 = vmatprep.mubr.msk.bf16.mxu0 %vm3302_vm0, %v3301_v1 }
0x1591   :  { %3052 = vmatmul.mubr.msk.bf16.vlgmr.msra.gmra.mrb[56].mxu1 %vm111_vm2, %v1876_v34 }
0x1592   :  { %3063 = vmatprep.mubr.msk.bf16.mxu1 %vm3302_vm0, %v3301_v1 }
0x165a   :  { %v3759_v35 = vpop.f32.mrb[56].mxu0 }
0x165b   :  { %v3035_v36 = vpop.f32.mrb[57].mxu0 }
0x165c   :  { %v1774_v39 = vpop.f32.mrb[58].mxu0  ;;  %v3761_v41 = vpop.f32.mrb[52].mxu1 }
0x165d   :  { %v3160_v42 = vpack.i.bf16 %v3761_v41, %v3759_v35  ;;  %v3036_v45 = vpop.f32.mrb[59].mxu0  ;;  %v3041_v47 = vpop.f32.mrb[53].mxu1 }
0x165e   :  { %v1822_v48 = vpop.f32.mrb[54].mxu1 }
0x165f   :  { %v3042_v50 = vpop.f32.mrb[55].mxu1 }
0x1662   :  { %v1869_v52 = vpop.f32.mrb[60].mxu0 }
0x1663   :  { %v3047_v53 = vpop.f32.mrb[61].mxu0  ;;  %v1925_v54 = vsel %vm111_vm2, %v1869_v52, -inf }
0x1664   :  { %v1919_v58 = vpop.f32.mrb[56].mxu1  ;;  %1926 = vmax.xlane.f32.xlu1 %v1925_v54  ;;  %v1872_v61 = vpop.f32.mrb[62].mxu0 }
0x1665   :  { %v3048_v59 = vpop.f32.mrb[63].mxu0  ;;  %v3053_v60 = vpop.f32.mrb[57].mxu1  ;;  %v1928_v62 = vsel %vm111_vm2, %v1919_v58, -inf }
0x1666   :  { %1929 = vmax.xlane.f32.xlu0 %v1928_v62  ;;  %v1922_v63 = vpop.f32.mrb[58].mxu1 }
0x1667   :  { %v3054_v0 = vpop.f32.mrb[59].mxu1 }
0x1675   :  { %1997 = vrot.lane.b32.xlu1 %v3665_v49, %s3310_s9 }
0x167c   :  { %1949 = vrot.lane.b32.xlu0 %v3663_v46, %s3310_s9 }
0x16f1   :  { %v1927_v5 = vpop.xlane.xlu1 %1926 }
0x16f2   :  { %v1931_v6 = vsub.f32 %v1869_v52, %v1927_v5 }
0x16f3   :  { %v1930_v10 = vpop.xlane.xlu0 %1929 }
0x16f4   :  { %v1933_v11 = vmul.f32 1.442695, %v1931_v6  ;;  %v1932_v12 = vsub.f32 %v1919_v58, %v1930_v10 }
0x16f5   :  { %v1998_v13 = vpop.permute.xlu1 %1997 }
0x16f6   :  { %3253 = vpow2.f32 %v1933_v11  ;;  %v1935_v14 = vmul.f32 1.442695, %v1932_v12  ;;  %v2003_v16 = vsel %vm235_vm3, %v1998_v13, 0 }
0x16f7   :  { %v1950_v17 = vpop.permute.xlu0 %1949  ;;  %3062 = vmatpush3.bf16.msra.mxu1 %v2003_v16 }
0x16f8   :  { %3255 = vpow2.f32 %v1935_v14  ;;  %v1955_v15 = vsel %vm235_vm3, %v1950_v17, 0  ;;  %3073 = vmatprep.subr.bf16.mxu1 %v3301_v1 }
0x16f9   :  { %3056 = vmatpush3.bf16.msra.mxu0 %v1955_v15 }
0x16fa   :  { %3067 = vmatprep.subr.bf16.mxu0 %v3301_v1 }
0x1700   :  { %v3254_v19 = vpop.eup %3253 }
0x1701   :  { %v1937_v51 = vsel %vm111_vm2, %v3254_v19, 0.0 }
0x1702   :  { %v3256_v55 = vpop.eup %3255  ;;  %1938 = vadd.xlane.f32.xlu0 %v1937_v51 }
0x1703   :  { %v1940_v56 = vsel %vm111_vm2, %v3256_v55, 0.0 }
0x1704   :  { %1941 = vadd.xlane.f32.xlu1 %v1940_v56 }
0x1715   :  { %2047 = vrot.lane.b32.xlu1 %v3663_v46, %s3311_s10 }
0x1718   :  { %2097 = vrot.lane.b32.xlu0 %v3665_v49, %s3311_s10 }
0x1719   :  { %2045 = vrot.lane.b32.xlu1 %v3663_v46, %s3312_s11 }
0x171c   :  { %2095 = vrot.lane.b32.xlu0 %v3665_v49, %s3312_s11 }
0x178f   :  { %v1939_v3 = vpop.xlane.xlu0 %1938 }
0x1790   :  { %3257 = vrcp.f32 %v1939_v3 }
0x1791   :  { %v1942_v4 = vpop.xlane.xlu1 %1941 }
0x1792   :  { %3259 = vrcp.f32 %v1942_v4 }
0x1793   :  { %v2098_v27 = vpop.permute.xlu0 %2097 }
0x1794   :  { %v2103_v32 = vsel %vm111_vm2, %v2098_v27, 0 }
0x1795   :  { %v2048_v23 = vpop.permute.xlu1 %2047 }
0x1796   :  { %v2053_v29 = vsel %vm111_vm2, %v2048_v23, 0 }
0x1797   :  { %v2096_v34 = vpop.permute.xlu0 %2095 }
0x1799   :  { %v2046_v33 = vpop.permute.xlu1 %2045 }
0x179a   :  { %v3258_v20 = vpop.eup %3257 }
0x179b   :  { %v1945_v21 = vmul.f32 %v3258_v20, %v3254_v19 }
0x179c   :  { %v3260_v22 = vpop.eup %3259 }
0x179d   :  { %v1946_v24 = vmul.f32 %v3260_v22, %v3256_v55  ;;  %v1947_v25 = vpack.c.bf16 %v1945_v21, %v1945_v21 }
0x179f   :  { %3058 = vmatmul.mubr.msk.bf16.vlgmr.msra.gmra.mrb[64].mxu0 %vm111_vm2, %v1947_v25  ;;  %v1948_v31 = vpack.c.bf16 %v1946_v24, %v1946_v24  ;;  %v3187_v24 = vld [vmem:[%s3932_s3 + $0x30] sm:$0xff]   ;;  %v3188_v25 = vld [vmem:[%s3932_s3 + $0x38] sm:$0xff]  }
0x17a0   :  { %3068 = vmatpush3.bf16.xpose.msra.mxu0 %v2053_v29  ;;  %3069 = vmatprep.mubr.msk.bf16.mxu0 %vm3302_vm0, %v3301_v1 }
0x17a1   :  { %3064 = vmatmul.mubr.msk.bf16.vlgmr.msra.gmra.mrb[60].mxu1 %vm111_vm2, %v1948_v31  ;;  %3079 = vmatprep.subr.bf16.mxu0 %v3301_v1 }
0x17a2   :  { %3074 = vmatpush3.bf16.xpose.msra.mxu1 %v2103_v32  ;;  %3075 = vmatprep.mubr.msk.bf16.mxu1 %vm3302_vm0, %v3301_v1 }
0x17a3   :  { %3085 = vmatprep.subr.bf16.mxu1 %v3301_v1 }
0x17a7   :  { %3070 = vmatmul.mubr.msk.bf16.vlgmr.msra.gmra.mrb[68].mxu0 %vm111_vm2, %v2046_v33 }
0x17a8   :  { %3081 = vmatprep.mubr.msk.bf16.mxu0 %vm3302_vm0, %v3301_v1 }
0x17a9   :  { %3076 = vmatmul.mubr.msk.bf16.vlgmr.msra.gmra.mrb[64].mxu1 %vm111_vm2, %v2096_v34 }
0x17aa   :  { %3087 = vmatprep.mubr.msk.bf16.mxu1 %vm3302_vm0, %v3301_v1 }
0x1872   :  { %v1991_v36 = vpop.f32.mrb[64].mxu0 }
0x1873   :  { %v3059_v39 = vpop.f32.mrb[65].mxu0 }
0x1874   :  { %v1994_v45 = vpop.f32.mrb[66].mxu0  ;;  %v2039_v47 = vpop.f32.mrb[60].mxu1 }
0x1875   :  { %v3165_v48 = vpack.i.bf16 %v2039_v47, %v1991_v36  ;;  %v3060_v50 = vpop.f32.mrb[67].mxu0  ;;  %v3065_v52 = vpop.f32.mrb[61].mxu1 }
0x1876   :  { %v2042_v53 = vpop.f32.mrb[62].mxu1 }
0x1877   :  { %v3066_v54 = vpop.f32.mrb[63].mxu1 }
0x187a   :  { %v2089_v58 = vpop.f32.mrb[68].mxu0 }
0x187b   :  { %v3071_v61 = vpop.f32.mrb[69].mxu0  ;;  %v2145_v59 = vsel %vm111_vm2, %v2089_v58, -inf }
0x187c   :  { %v2139_v60 = vpop.f32.mrb[64].mxu1  ;;  %2146 = vmax.xlane.f32.xlu1 %v2145_v59  ;;  %v2092_v62 = vpop.f32.mrb[70].mxu0 }
0x187d   :  { %v3072_v63 = vpop.f32.mrb[71].mxu0  ;;  %v3077_v0 = vpop.f32.mrb[65].mxu1  ;;  %v2148_v5 = vsel %vm111_vm2, %v2139_v60, -inf }
0x187e   :  { %2149 = vmax.xlane.f32.xlu0 %v2148_v5  ;;  %v2142_v6 = vpop.f32.mrb[66].mxu1 }
0x187f   :  { %v3078_v10 = vpop.f32.mrb[67].mxu1 }
0x1909   :  { %v2147_v11 = vpop.xlane.xlu1 %2146 }
0x190a   :  { %v2151_v12 = vsub.f32 %v2089_v58, %v2147_v11 }
0x190b   :  { %v2150_v13 = vpop.xlane.xlu0 %2149 }
0x190c   :  { %v2153_v14 = vmul.f32 1.442695, %v2151_v12  ;;  %v2152_v16 = vsub.f32 %v2139_v60, %v2150_v13 }
0x190e   :  { %3261 = vpow2.f32 %v2153_v14  ;;  %v2155_v17 = vmul.f32 1.442695, %v2152_v16 }
0x1910   :  { %3263 = vpow2.f32 %v2155_v17 }
0x1918   :  { %v3262_v15 = vpop.eup %3261 }
0x1919   :  { %v2157_v19 = vsel %vm111_vm2, %v3262_v15, 0.0 }
0x191a   :  { %v3264_v51 = vpop.eup %3263  ;;  %2158 = vadd.xlane.f32.xlu0 %v2157_v19 }
0x191b   :  { %v2160_v55 = vsel %vm111_vm2, %v3264_v51, 0.0 }
0x191c   :  { %2161 = vadd.xlane.f32.xlu1 %v2160_v55 }
0x192d   :  { %2217 = vrot.lane.b32.xlu1 %v3665_v49, %s3313_s12 }
0x1930   :  { %2169 = vrot.lane.b32.xlu0 %v3663_v46, %s3313_s12 }
0x1931   :  { %3161 = vrot.lane.b32.xlu1 %v3160_v42, %s3314_s13 }
0x1934   :  { %3166 = vrot.lane.b32.xlu0 %v3165_v48, %s3315_s14 }
0x19a7   :  { %v2159_v56 = vpop.xlane.xlu0 %2158 }
0x19a8   :  { %3265 = vrcp.f32 %v2159_v56 }
0x19a9   :  { %v2162_v3 = vpop.xlane.xlu1 %2161 }
0x19aa   :  { %3267 = vrcp.f32 %v2162_v3 }
0x19ab   :  { %v2170_v4 = vpop.permute.xlu0 %2169 }
0x19ac   :  { %v2175_v20 = vsel %vm235_vm3, %v2170_v4, 0 }
0x19ad   :  { %3080 = vmatpush3.bf16.msra.mxu0 %v2175_v20  ;;  %v2218_v21 = vpop.permute.xlu1 %2217 }
0x19ae   :  { %v2223_v49 = vsel %vm235_vm3, %v2218_v21, 0  ;;  %3091 = vmatprep.subr.bf16.mxu0 %v3301_v1 }
0x19af   :  { %3086 = vmatpush3.bf16.msra.mxu1 %v2223_v49  ;;  %v3167_v52 = vpop.permute.xlu0 %3166 }
0x19b0   :  { %3099 = vmatprep.subr.bf16.mxu1 %v3301_v1  ;;  %v3169_v58 = vunpack.i.h.bf16 %v3167_v52  ;;  %v3168_v61 = vunpack.i.l.bf16 %v3167_v52 }
0x19b1   :  { %v3162_v47 = vpop.permute.xlu1 %3161 }
0x19b2   :  { %v3266_v46 = vpop.eup %3265  ;;  %v3164_v48 = vunpack.i.h.bf16 %v3162_v47  ;;  %v3163_v50 = vunpack.i.l.bf16 %v3162_v47 }
0x19b3   :  { %v2165_v35 = vmul.f32 %v3266_v46, %v3262_v15 }
0x19b4   :  { %v3268_v41 = vpop.eup %3267  ;;  %v2290_v53 = vsel %vm111_vm2, %v3721_v44, %v3164_v48  ;;  %v2289_v54 = vsel %vm111_vm2, %v3719_v9, %v3163_v50  ;;  %v2299_v9 = vrot.slane %v3659_v40, %v1022_v2 }
0x19b5   :  { %v2166_v42 = vmul.f32 %v3268_v41, %v3264_v51  ;;  %v2167_v22 = vpack.c.bf16 %v2165_v35, %v2165_v35  ;;  %v2291_v63 = vsel %vm1013_vm4, %v2289_v54, %v3168_v61  ;;  %v2292_v0 = vsel %vm1013_vm4, %v2290_v53, %v3169_v58  ;;  %v3190_v35 = vld [vmem:[%s3931_s2 + $0x18] sm:$0xff]   ;;  %v3191_v41 = vld [vmem:[%s3932_s3 + $0x40] sm:$0xff]  }
0x19b6   :  { %v2405_v53 = vrot.slane %v3659_v40, %v1128_v43 }
0x19b7   :  { %3082 = vmatmul.mubr.msk.bf16.vlgmr.msra.gmra.mrb[72].mxu0 %vm111_vm2, %v2167_v22  ;;  %v2168_v23 = vpack.c.bf16 %v2166_v42, %v2166_v42  ;;  %v3192_v42 = vld [vmem:[%s3932_s3 + $0x48] sm:$0xff]  }
0x19b8   :  { %3095 = vmatprep.mubr.msk.bf16.mxu0 %vm3302_vm0, %v3301_v1  ;;  %3092 = vmatpush3.bf16.msra.mxu0 %v3187_v24 }
0x19b9   :  { %3088 = vmatmul.mubr.msk.bf16.vlgmr.msra.gmra.mrb[68].mxu1 %vm111_vm2, %v2168_v23  ;;  %3093 = vmatprep.subr.bf16.mxu0 %v3301_v1 }
0x19ba   :  { %3103 = vmatprep.mubr.msk.bf16.mxu1 %vm3302_vm0, %v3301_v1 }
0x19bc   :  { %3094 = vmatpush3.bf16.msra.mxu0 %v3188_v25 }
0x19bd   :  { %3107 = vmatprep.subr.bf16.mxu0 %v3301_v1 }
0x1a8a   :  { %v2211_v27 = vpop.f32.mrb[72].mxu0 }
0x1a8b   :  { %v3083_v29 = vpop.f32.mrb[73].mxu0 }
0x1a8c   :  { %v2214_v31 = vpop.f32.mrb[74].mxu0  ;;  %v2259_v32 = vpop.f32.mrb[68].mxu1 }
0x1a8d   :  { %v3170_v33 = vpack.i.bf16 %v2259_v32, %v2211_v27  ;;  %v3084_v34 = vpop.f32.mrb[75].mxu0  ;;  %v3089_v36 = vpop.f32.mrb[69].mxu1  ;;  %v2387_v32 = vrot.slane %v3659_v40, %v1111_v18  ;;  %v3193_v18 = vld [vmem:[%s3932_s3 + $0x50] sm:$0xff]  }
0x1a8e   :  { %v2262_v39 = vpop.f32.mrb[70].mxu1 }
0x1a8f   :  { %v3090_v45 = vpop.f32.mrb[71].mxu1  ;;  %3171 = vrot.lane.b32.xlu1 %v3170_v33, %s3316_s19 }
0x1a90   :  { %v2393_v45 = vrot.slane %v3659_v40, %v1117_v30  ;;  %v3194_v30 = vld [vmem:[%s3932_s3 + $0x58] sm:$0xff]  }
0x1b01   :  { %v3172_v59 = vpop.permute.xlu1 %3171 }
0x1b02   :  { %v3174_v60 = vunpack.i.h.bf16 %v3172_v59  ;;  %v3173_v62 = vunpack.i.l.bf16 %v3172_v59 }
0x1b04   :  { %v2294_v5 = vsel %vm1016_vm5, %v2292_v0, %v3174_v60  ;;  %v2293_v6 = vsel %vm1016_vm5, %v2291_v63, %v3173_v62 }
0x1b05   :  { %v2295_v10 = vpack.c.bf16 %v2294_v5, %v2293_v6  ;;  %v2468_v6 = vrot.slane %v3659_v40, %v1191_v57 }
0x1b07   :  { %3096 = vmatmul.mubr.msk.bf16.vlgmr.msra.gmra.mrb[76].mxu0 %vm58_vm1, %v2295_v10 }
0x1b08   :  { %3115 = vmatprep.mubr.msk.bf16.mxu0 %vm3302_vm0, %v3301_v1  ;;  %3108 = vmatpush3.bf16.msra.mxu0 %v3191_v41 }
0x1b09   :  { %3109 = vmatprep.subr.bf16.mxu0 %v3301_v1 }
0x1b0c   :  { %3110 = vmatpush3.bf16.msra.mxu0 %v3192_v42 }
0x1b0d   :  { %3111 = vmatprep.subr.bf16.mxu0 %v3301_v1 }
0x1b10   :  { %3112 = vmatpush3.bf16.msra.mxu0 %v3193_v18 }
0x1b11   :  { %3113 = vmatprep.subr.bf16.mxu0 %v3301_v1 }
0x1b14   :  { %3114 = vmatpush3.bf16.msra.mxu0 %v3194_v30 }
0x1bda   :  { %v2349_v44 = vpop.f32.mrb[76].mxu0 }
0x1bdb   :  { %v2350_v11 = vadd.f32 %v2349_v44, %v2299_v9  ;;  %v3097_v12 = vpop.f32.mrb[77].mxu0 }
0x1bdc   :  { %v2352_v13 = vpop.f32.mrb[78].mxu0 }
0x1bdd   :  { %v2353_v14 = vadd.f32 %v2352_v13, %v2299_v9  ;;  %v3098_v16 = vpop.f32.mrb[79].mxu0  ;;  %v2356_v17 = vadd.f32 %v2350_v11, %v3647_v37 }
0x1bdf   :  { %v2357_v15 = vadd.f32 %v2353_v14, %v3649_v38  ;;  %v2358_v19 = vsel %vm58_vm1, %v2356_v17, 0.0  ;;  %v3189_v38 = vld [vmem:[%s3931_s2 + $0x10] sm:$0xff]  }
0x1be0   :  { %2359 = vadd.xlane.f32.xlu0 %v2358_v19  ;;  %3100 = vmatpush3.bf16.msra.mxu1 %v3189_v38 }
0x1be1   :  { %v2361_v51 = vsel %vm58_vm1, %v2357_v15, 0.0  ;;  %3101 = vmatprep.subr.bf16.mxu1 %v3301_v1 }
0x1be2   :  { %2362 = vadd.xlane.f32.xlu1 %v2361_v51 }
0x1be4   :  { %3102 = vmatpush3.bf16.msra.mxu1 %v3190_v35 }
0x1be5   :  { %3119 = vmatprep.subr.bf16.mxu1 %v3301_v1 }
0x1c6d   :  { %v2360_v55 = vpop.xlane.xlu0 %2359 }
0x1c6e   :  { %v2364_v56 = vmul.f32 0.03125, %v2360_v55 }
0x1c6f   :  { %v2363_v3 = vpop.xlane.xlu1 %2362 }
0x1c70   :  { %v2366_v2 = vsub.f32 %v2356_v17, %v2364_v56  ;;  %v2365_v4 = vmul.f32 0.03125, %v2363_v3 }
0x1c72   :  { %v2367_v20 = vsub.f32 %v2357_v15, %v2365_v4  ;;  %v2368_v21 = vmul.f32 %v2366_v2, %v2366_v2 }
0x1c74   :  { %v2370_v49 = vsel %vm58_vm1, %v2368_v21, 0.0  ;;  %v2369_v46 = vmul.f32 %v2367_v20, %v2367_v20  ;;  %v3195_v21 = vld [vmem:[%s3932_s3 + $0x60] sm:$0xff]  }
0x1c75   :  { %2371 = vadd.xlane.f32.xlu0 %v2370_v49  ;;  %v3196_v49 = vld [vmem:[%s3932_s3 + $0x68] sm:$0xff]  }
0x1c76   :  { %v2373_v37 = vsel %vm58_vm1, %v2369_v46, 0.0 }
0x1c79   :  { %2374 = vadd.xlane.f32.xlu0 %v2373_v37 }
0x1d02   :  { %v2372_v22 = vpop.xlane.xlu0 %2371 }
0x1d03   :  { %v2376_v23 = vmul.f32 0.03125, %v2372_v22  ;;  %v2568_v22 = vrot.slane %v3659_v40, %v1292_v26 }
0x1d05   :  { %v2378_v24 = vadd.f32 1e-05, %v2376_v23 }
0x1d06   :  { %v2375_v25 = vpop.xlane.xlu0 %2374 }
0x1d07   :  { %3269 = vrsqrt.f32 %v2378_v24  ;;  %v2377_v27 = vmul.f32 0.03125, %v2375_v25 }
0x1d09   :  { %v2379_v29 = vadd.f32 1e-05, %v2377_v27 }
0x1d0b   :  { %3271 = vrsqrt.f32 %v2379_v29 }
0x1d11   :  { %v3270_v31 = vpop.eup %3269 }
0x1d12   :  { %v2382_v33 = vmul.f32 %v3270_v31, %v2366_v2 }
0x1d14   :  { %v2388_v36 = vmul.f32 %v2387_v32, %v2382_v33 }
0x1d15   :  { %v3272_v34 = vpop.eup %3271 }
0x1d16   :  { %v2383_v39 = vmul.f32 %v3272_v34, %v2367_v20  ;;  %v2394_v48 = vadd.f32 %v2393_v45, %v2388_v36  ;;  %v2752_v36 = vld [vmem:[%s3933_s4 + $0x10] sm:$0xff] }
0x1d17   :  { %v2588_v26 = vrot.slane %v2752_v36, %v3381_v8 }
0x1d18   :  { %v2389_v47 = vmul.f32 %v2387_v32, %v2383_v39 }
0x1d1a   :  { %v2395_v50 = vadd.f32 %v2393_v45, %v2389_v47 }
0x1d1c   :  { %v2396_v52 = vpack.c.bf16 %v2395_v50, %v2394_v48 }
0x1d1e   :  { %3104 = vmatmul.mubr.msk.bf16.vlgmr.msra.gmra.mrb[72].mxu1 %vm58_vm1, %v2396_v52 }
0x1d1f   :  { %3123 = vmatprep.mubr.msk.bf16.mxu1 %vm3302_vm0, %v3301_v1  ;;  %3120 = vmatpush3.bf16.msra.mxu1 %v3195_v21 }
0x1d20   :  { %3121 = vmatprep.subr.bf16.mxu1 %v3301_v1  ;;  %v2574_v1 = vrot.slane %v3659_v40, %v1298_v28 }
0x1d23   :  { %3122 = vmatpush3.bf16.msra.mxu1 %v3196_v49 }
0x1df1   :  { %v2455_v54 = vpop.f32.mrb[72].mxu1 }
0x1df2   :  { %v2456_v58 = vadd.f32 %v2455_v54, %v2405_v53  ;;  %v3105_v61 = vpop.f32.mrb[73].mxu1 }
0x1df3   :  { %v2458_v59 = vpop.f32.mrb[74].mxu1 }
0x1df4   :  { %v2459_v60 = vadd.f32 %v2458_v59, %v2405_v53  ;;  %v3106_v62 = vpop.f32.mrb[75].mxu1  ;;  %v2462_v63 = vmax.f32 %v2456_v58, 0.0 }
0x1df6   :  { %v2463_v0 = vmax.f32 %v2459_v60, 0.0 }
0x1df8   :  { %v2464_v5 = vpack.c.bf16 %v2463_v0, %v2462_v63 }
0x1dfa   :  { %3116 = vmatmul.mubr.msk.bf16.vlgmr.msra.gmra.mrb[80].mxu0 %vm1217_vm6, %v2464_v5 }
0x1ecd   :  { %v2530_v10 = vpop.f32.mrb[80].mxu0 }
0x1ece   :  { %v2531_v9 = vadd.f32 %v2530_v10, %v2468_v6  ;;  %v3117_v44 = vpop.f32.mrb[81].mxu0 }
0x1ecf   :  { %v2533_v11 = vpop.f32.mrb[82].mxu0 }
0x1ed0   :  { %v2537_v43 = vadd.f32 %v2531_v9, %v2394_v48  ;;  %v2534_v12 = vadd.f32 %v2533_v11, %v2468_v6  ;;  %v3118_v13 = vpop.f32.mrb[83].mxu0 }
0x1ed2   :  { %v2539_v14 = vsel %vm58_vm1, %v2537_v43, 0.0  ;;  %v2538_v16 = vadd.f32 %v2534_v12, %v2395_v50 }
0x1ed3   :  { %2540 = vadd.xlane.f32.xlu1 %v2539_v14 }
0x1ed4   :  { %v2542_v17 = vsel %vm58_vm1, %v2538_v16, 0.0 }
0x1ed5   :  { %2543 = vadd.xlane.f32.xlu0 %v2542_v17 }
0x1f60   :  { %v2541_v15 = vpop.xlane.xlu1 %2540 }
0x1f61   :  { %v2545_v19 = vmul.f32 0.03125, %v2541_v15 }
0x1f62   :  { %v2544_v51 = vpop.xlane.xlu0 %2543 }
0x1f63   :  { %v2547_v55 = vsub.f32 %v2537_v43, %v2545_v19  ;;  %v2546_v56 = vmul.f32 0.03125, %v2544_v51 }
0x1f65   :  { %v2548_v57 = vsub.f32 %v2538_v16, %v2546_v56  ;;  %v2549_v3 = vmul.f32 %v2547_v55, %v2547_v55 }
0x1f67   :  { %v2551_v2 = vsel %vm58_vm1, %v2549_v3, 0.0  ;;  %v2550_v4 = vmul.f32 %v2548_v57, %v2548_v57 }
0x1f68   :  { %2552 = vadd.xlane.f32.xlu1 %v2551_v2 }
0x1f69   :  { %v2554_v20 = vsel %vm58_vm1, %v2550_v4, 0.0 }
0x1f6a   :  { %2555 = vadd.xlane.f32.xlu0 %v2554_v20 }
0x1ff5   :  { %v2553_v46 = vpop.xlane.xlu1 %2552 }
0x1ff6   :  { %v2557_v37 = vmul.f32 0.03125, %v2553_v46 }
0x1ff7   :  { %v2556_v38 = vpop.xlane.xlu0 %2555 }
0x1ff8   :  { %v2559_v35 = vadd.f32 1e-05, %v2557_v37  ;;  %v2558_v41 = vmul.f32 0.03125, %v2556_v38 }
0x1ffa   :  { %3273 = vrsqrt.f32 %v2559_v35  ;;  %v2560_v42 = vadd.f32 1e-05, %v2558_v41 }
0x1ffc   :  { %3275 = vrsqrt.f32 %v2560_v42 }
0x2004   :  { %v3274_v23 = vpop.eup %3273 }
0x2005   :  { %v2563_v24 = vmul.f32 %v3274_v23, %v2547_v55 }
0x2006   :  { %v3276_v25 = vpop.eup %3275 }
0x2007   :  { %v2569_v27 = vmul.f32 %v2568_v22, %v2563_v24  ;;  %v2564_v29 = vmul.f32 %v3276_v25, %v2548_v57 }
0x2009   :  { %v2570_v31 = vmul.f32 %v2568_v22, %v2564_v29  ;;  %v2575_v32 = vadd.f32 %v2574_v1, %v2569_v27 }
0x200b   :  { %v2576_v33 = vadd.f32 %v2574_v1, %v2570_v31 }
0x200d   :  { %v2584_v34 = vpack.c.bf16 %v2576_v33, %v2575_v32 }
0x200f   :  { %3124 = vmatmul.mubr.msk.bf16.vlgmr.msra.gmra.mrb[76].mxu1 %vm58_vm1, %v2584_v34 }
0x20e2   :  { %v2638_v39 = vpop.f32.mrb[76].mxu1 }
0x20e3   :  { %v2639_v45 = vadd.f32 %v2638_v39, %v2588_v26  ;;  %v3125_v47 = vpop.f32.mrb[77].mxu1 }
0x20e4   :  { %v2641_v7 = vpop.f32.mrb[78].mxu1 }
0x20e5   :  { %2645 = vst.msk [vmem:[#allocation2] sm:$0xff] %vm58_vm1, %v2639_v45  ;;  %v2642_v28 = vadd.f32 %v2641_v7, %v2588_v26  ;;  %v3126_v40 = vpop.f32.mrb[79].mxu1 }
0x20e7   :  { %2646 = vst.msk [vmem:[#allocation2 + $0x8] sm:$0xff] %vm58_vm1, %v2642_v28 }
0x20e8   :  { %3288 = shalt.err (!%p3285_p4)
}
0x20e9   :  { %s3289_s1 = scalar_lea.hbm %s3934_s5, 256 }
0x20ea   :  { %p3290_p5 = scmp.ne.s32.totalorder %s3934_s5, %s3289_s1  ;;  %p3293_p6 = scmp.lt.u32.totalorder %s3289_s1, %s3934_s5 }
0x20ec   :  { %p3295_p7 = pnand %p3293_p6, %p3290_p5 }
0x20ee   :  { %3298 = shalt.err (!%p3295_p7)
}
0x20ef   :  { %s3318_s30 = smov 128  }
0x20f0   :  { %2658 = dma.vmem_to_hbm [thread:$0]  %s2653_s21, 256, %s3934_s5, [#allocation3], %s3318_s30, %s3318_s30, %s3314_s13  }
0x20f1   :  { %3299 = dma.done.wait [#allocation3], 256  }
0x20f2   :  { %3300 = vsyncadd [#allocation3], 4294967040 }
0x20f3   :  { %2662 = vsyncpa [#allocation3], 1 }

</bundles_post_ra>
